<compile_context>
chip_gen: v5e
topology: v5e:2x2
jax: 0.10.0
libtpu: 0.0.40
codegen_flags: <defaults>
</compile_context>

<pallas_src>
import functools

import jax
import jax.numpy as jnp
from jax.experimental import pallas as pl
from jax.experimental.pallas import tpu as pltpu

# ---- module hyperparameters (synthetic, small) ------------------------------
PACKET_REP_DIM = 32
CONVERSATIONAL_HIDDEN_DIM = 32
CONVERSATIONAL_LAYERS = 2
CONV_LSTM_DROPOUT = 0.1
# TODO(synk): training-mode inter-layer dropout (CONV_LSTM_DROPOUT) not applied
#             (forward reproduces eval-mode nn.LSTM semantics).


def _sigmoid_1eup(v):
    # sigmoid(x) == 0.5 * tanh(0.5 * x) + 0.5  -> one EUP transcendental.
    return 0.5 * jnp.tanh(0.5 * v) + 0.5


# ---- Pallas kernel: all layers, whole sequence, one invocation ---------------
def _fused_lstm_kernel(*refs, T, B, H, L):
    # refs = [x, (wih_t, whh_t, bias) * L, h0, c0]  +  [y, hc]
    x_ref = refs[0]                               # (T*B, D)   time-major rows, B padded to 8
    w_refs = refs[1:1 + 3 * L]
    h0_ref = refs[1 + 3 * L]                      # (L, B, H)
    c0_ref = refs[2 + 3 * L]                      # (L, B, H)
    y_ref = refs[3 + 3 * L]                       # (B, T*H)   lane-dense final-layer output
    hc_ref = refs[4 + 3 * L]                      # (B, 2*L*H) lane-dense packed (h, c) per layer

    wih = [w_refs[3 * l][...] for l in range(L)]          # (D_l, 4H)
    whh = [w_refs[3 * l + 1][...] for l in range(L)]      # (H, 4H)
    bias = [w_refs[3 * l + 2][...] for l in range(L)]     # (1, 4H)

    # Hoisted, non-recurrent layer-0 input projection: one bulk MXU matmul over all
    # timesteps; per-step slices are 8-sublane aligned because B == 8 (padded).
    xp0 = jnp.dot(x_ref[...], wih[0], preferred_element_type=jnp.float32) + bias[0]  # (T*B, 4H)

    h = [h0_ref[l] for l in range(L)]             # (B, H) each
    c = [c0_ref[l] for l in range(L)]

    # Wavefront-fused, fully-unrolled recurrence: layer l step t follows layer l-1
    # step t; independent chains (layer-1 t+1 vs layer-2 t) overlap in the scheduler.
    for t in range(T):
        for l in range(L):
            if l == 0:
                pre = xp0[t * B:(t + 1) * B, :]                                   # aligned slice
            else:
                pre = jnp.dot(h[l - 1], wih[l],
                              preferred_element_type=jnp.float32) + bias[l]       # (B, 4H)
            gates = pre + jnp.dot(h[l], whh[l], preferred_element_type=jnp.float32)  # [i,f,g,o]
            sig = _sigmoid_1eup(gates)            # one EUP op on the full (B, 4H) tile
            tnh = jnp.tanh(gates)                 # one EUP op on the full (B, 4H) tile
            i_g = sig[:, 0 * H:1 * H]
            f_g = sig[:, 1 * H:2 * H]
            g_g = tnh[:, 2 * H:3 * H]
            o_g = sig[:, 3 * H:4 * H]
            c[l] = f_g * c[l] + i_g * g_g
            h[l] = o_g * jnp.tanh(c[l])
        y_ref[:, t * H:(t + 1) * H] = h[L - 1]    # store off the recurrent path

    for l in range(L):                            # packed lane-dense (B, 2*L*H) slab
        hc_ref[:, (2 * l) * H:(2 * l + 1) * H] = h[l]
        hc_ref[:, (2 * l + 1) * H:(2 * l + 2) * H] = c[l]


@jax.jit
def _conversation_lstm_forward(x, h0, c0, weights):
    """x: (B, T, D) f32; h0/c0: (L, B, H) f32; weights: tuple of (wih_t, whh_t, bias)."""
    B, T, D = x.shape
    L = len(weights)
    H = weights[0][1].shape[0]

    # Pad batch to a multiple of 8 so every per-timestep tile is sublane-aligned.
    B_pad = max(8, ((B + 7) // 8) * 8)
    pad_b = B_pad - B
    x_p = jnp.pad(x, ((0, pad_b), (0, 0), (0, 0)))
    h0_p = jnp.pad(h0, ((0, 0), (0, pad_b), (0, 0)))
    c0_p = jnp.pad(c0, ((0, 0), (0, pad_b), (0, 0)))

    # time-major row order (t*B_pad + b) so per-timestep slices are contiguous
    x_tm = jnp.transpose(x_p, (1, 0, 2)).reshape(T * B_pad, D)

    flat_w = []
    for (wih_t, whh_t, bias) in weights:
        flat_w.extend([wih_t, whh_t, bias])

    vmem_spec = functools.partial(pl.BlockSpec, memory_space=pltpu.MemorySpace.VMEM)
    n_in = 1 + 3 * L + 2

    y_flat, hc = pl.pallas_call(
        functools.partial(_fused_lstm_kernel, T=T, B=B_pad, H=H, L=L),
        out_shape=(jax.ShapeDtypeStruct((B_pad, T * H), jnp.float32),
                   jax.ShapeDtypeStruct((B_pad, 2 * L * H), jnp.float32)),
        in_specs=[vmem_spec() for _ in range(n_in)],
        out_specs=(vmem_spec(), vmem_spec()),
    )(x_tm, *flat_w, h0_p, c0_p)

    outputs = y_flat[:B].reshape(B, T, H)                           # batch_first
    h_n = jnp.stack([hc[:B, (2 * l) * H:(2 * l + 1) * H] for l in range(L)], axis=0)
    c_n = jnp.stack([hc[:B, (2 * l + 1) * H:(2 * l + 2) * H] for l in range(L)], axis=0)
    return outputs, (h_n, c_n)


# ---- ConversationLSTM wrapper ------------------------------------------------
class ConversationLSTMPallas:
    """JAX/Pallas equivalent of the PyTorch ConversationLSTM module (eval-mode)."""

    def __init__(self, key):
        self.num_layers = CONVERSATIONAL_LAYERS
        self.hidden = CONVERSATIONAL_HIDDEN_DIM
        self.input_dim = PACKET_REP_DIM
        self.params = []           # PyTorch-layout params (kept for reference check)
        kernel_weights = []        # pre-transposed weights + fused bias for the kernel
        bound = 1.0 / (self.hidden ** 0.5)
        for layer in range(self.num_layers):
            in_dim = self.input_dim if layer == 0 else self.hidden
            key, k1, k2, k3, k4 = jax.random.split(key, 5)
            # PyTorch layout: weight_ih [4H, in_dim], weight_hh [4H, H], biases [4H]
            w_ih = jax.random.uniform(k1, (4 * self.hidden, in_dim),
                                      jnp.float32, -bound, bound)
            w_hh = jax.random.uniform(k2, (4 * self.hidden, self.hidden),
                                      jnp.float32, -bound, bound)
            b_ih = jax.random.uniform(k3, (4 * self.hidden,),
                                      jnp.float32, -bound, bound)
            b_hh = jax.random.uniform(k4, (4 * self.hidden,),
                                      jnp.float32, -bound, bound)
            self.params.append((w_ih, w_hh, b_ih, b_hh))
            kernel_weights.append((jnp.transpose(w_ih),                       # (in_dim, 4H)
                                   jnp.transpose(w_hh),                       # (H, 4H)
                                   (b_ih + b_hh).reshape(1, 4 * self.hidden)  # (1, 4H)
                                   ))
        self.kernel_weights = tuple(kernel_weights)

    def init_hidden(self, batch_size):
        h = jnp.zeros((self.num_layers, batch_size, self.hidden), jnp.float32)
        c = jnp.zeros((self.num_layers, batch_size, self.hidden), jnp.float32)
        return (h, c)

    def __call__(self, packet_representations, hidden_state=None):
        """
        packet_representations: [batch, num_packets, PACKET_REP_DIM]
        hidden_state: optional (h, c), each [num_layers, batch, hidden]
        returns: outputs [batch, num_packets, hidden], (h_n, c_n)
        """
        x = jnp.asarray(packet_representations, jnp.float32)
        B = x.shape[0]
        if hidden_state is None:
            hidden_state = self.init_hidden(B)
        h0 = jnp.asarray(hidden_state[0], jnp.float32)
        c0 = jnp.asarray(hidden_state[1], jnp.float32)
        return _conversation_lstm_forward(x, h0, c0, self.kernel_weights)


# ---- pure-JAX reference (for sanity check only) ------------------------------
def _reference_lstm(x, params, h0_all, c0_all):
    layer_in = x
    h_fin, c_fin = [], []
    for layer, (w_ih, w_hh, b_ih, b_hh) in enumerate(params):
        def step(carry, x_t):
            h, c = carry
            g = x_t @ w_ih.T + h @ w_hh.T + b_ih + b_hh
            H = h.shape[-1]
            i = jax.nn.sigmoid(g[:, :H])
            f = jax.nn.sigmoid(g[:, H:2 * H])
            gg = jnp.tanh(g[:, 2 * H:3 * H])
            o = jax.nn.sigmoid(g[:, 3 * H:])
            c_new = f * c + i * gg
            h_new = o * jnp.tanh(c_new)
            return (h_new, c_new), h_new

        (hT, cT), ys = jax.lax.scan(step, (h0_all[layer], c0_all[layer]),
                                    jnp.transpose(layer_in, (1, 0, 2)))
        layer_in = jnp.transpose(ys, (1, 0, 2))
        h_fin.append(hT)
        c_fin.append(cT)
    return layer_in, (jnp.stack(h_fin), jnp.stack(c_fin))


if __name__ == "__main__":
    key = jax.random.PRNGKey(0)
    k_model, k_x = jax.random.split(key)

    model = ConversationLSTMPallas(k_model)

    batch, num_packets = 2, 8
    x = jax.random.normal(k_x, (batch, num_packets, PACKET_REP_DIM), jnp.float32)

    outputs, (h_n, c_n) = model(x)
    jax.block_until_ready((outputs, h_n, c_n))

    assert outputs.shape == (batch, num_packets, CONVERSATIONAL_HIDDEN_DIM)
    assert h_n.shape == (CONVERSATIONAL_LAYERS, batch, CONVERSATIONAL_HIDDEN_DIM)
    assert c_n.shape == (CONVERSATIONAL_LAYERS, batch, CONVERSATIONAL_HIDDEN_DIM)

    # sanity check against pure-JAX reference
    h0, c0 = model.init_hidden(batch)
    ref_out, (ref_h, ref_c) = _reference_lstm(x, model.params, h0, c0)
    assert jnp.allclose(outputs, ref_out, atol=2e-3, rtol=2e-3)
    assert jnp.allclose(h_n, ref_h, atol=2e-3, rtol=2e-3)
    assert jnp.allclose(c_n, ref_c, atol=2e-3, rtol=2e-3)

    print("KERNEL_OK")
</pallas_src>

<mosaic_0001>
module attributes {stable_mosaic.version = 11 : i64} {
  func.func @_fused_lstm_kernel(%arg0: memref<64x32xf32, #tpu.memory_space<vmem>>, %arg1: memref<32x128xf32, #tpu.memory_space<vmem>>, %arg2: memref<32x128xf32, #tpu.memory_space<vmem>>, %arg3: memref<1x128xf32, #tpu.memory_space<vmem>>, %arg4: memref<32x128xf32, #tpu.memory_space<vmem>>, %arg5: memref<32x128xf32, #tpu.memory_space<vmem>>, %arg6: memref<1x128xf32, #tpu.memory_space<vmem>>, %arg7: memref<2x8x32xf32, #tpu.memory_space<vmem>>, %arg8: memref<2x8x32xf32, #tpu.memory_space<vmem>>, %arg9: memref<8x256xf32, #tpu.memory_space<vmem>>, %arg10: memref<8x128xf32, #tpu.memory_space<vmem>>) attributes {dimension_semantics = [], scalar_prefetch = 0 : i64, scratch_operands = 0 : i64, tpu.core_type = #tpu.core_type<tc>} {
    %c0 = arith.constant 0 : index
    %c0_0 = arith.constant 0 : index
    %0 = vector.load %arg1[%c0, %c0_0] : memref<32x128xf32, #tpu.memory_space<vmem>>, vector<32x128xf32>
    %c0_1 = arith.constant 0 : index
    %c0_2 = arith.constant 0 : index
    %1 = vector.load %arg4[%c0_1, %c0_2] : memref<32x128xf32, #tpu.memory_space<vmem>>, vector<32x128xf32>
    %c0_3 = arith.constant 0 : index
    %c0_4 = arith.constant 0 : index
    %2 = vector.load %arg2[%c0_3, %c0_4] : memref<32x128xf32, #tpu.memory_space<vmem>>, vector<32x128xf32>
    %c0_5 = arith.constant 0 : index
    %c0_6 = arith.constant 0 : index
    %3 = vector.load %arg5[%c0_5, %c0_6] : memref<32x128xf32, #tpu.memory_space<vmem>>, vector<32x128xf32>
    %c0_7 = arith.constant 0 : index
    %c0_8 = arith.constant 0 : index
    %4 = vector.load %arg3[%c0_7, %c0_8] : memref<1x128xf32, #tpu.memory_space<vmem>>, vector<1x128xf32>
    %c0_9 = arith.constant 0 : index
    %c0_10 = arith.constant 0 : index
    %5 = vector.load %arg6[%c0_9, %c0_10] : memref<1x128xf32, #tpu.memory_space<vmem>>, vector<1x128xf32>
    %c0_11 = arith.constant 0 : index
    %c0_12 = arith.constant 0 : index
    %6 = vector.load %arg0[%c0_11, %c0_12] : memref<64x32xf32, #tpu.memory_space<vmem>>, vector<64x32xf32>
    %cst = arith.constant dense<0.000000e+00> : vector<64x128xf32>
    %7 = tpu.matmul %6, %0, %cst {dimension_numbers = #tpu.dot_dimension_numbers<[1], [0], [0], [1], [0, 0, 1, 1], [], []>} : vector<64x32xf32>, vector<32x128xf32>, vector<64x128xf32> -> vector<64x128xf32>
    %8 = vector.broadcast %4 : vector<1x128xf32> to vector<64x128xf32>
    %9 = arith.addf %7, %8 : vector<64x128xf32>
    %c0_13 = arith.constant 0 : index
    %c0_14 = arith.constant 0 : index
    %c0_15 = arith.constant 0 : index
    %10 = vector.load %arg7[%c0_13, %c0_14, %c0_15] : memref<2x8x32xf32, #tpu.memory_space<vmem>>, vector<1x8x32xf32>
    %11 = vector.shape_cast %10 : vector<1x8x32xf32> to vector<8x32xf32>
    %c1 = arith.constant 1 : index
    %c0_16 = arith.constant 0 : index
    %c0_17 = arith.constant 0 : index
    %12 = vector.load %arg7[%c1, %c0_16, %c0_17] : memref<2x8x32xf32, #tpu.memory_space<vmem>>, vector<1x8x32xf32>
    %13 = vector.shape_cast %12 : vector<1x8x32xf32> to vector<8x32xf32>
    %c0_18 = arith.constant 0 : index
    %c0_19 = arith.constant 0 : index
    %c0_20 = arith.constant 0 : index
    %14 = vector.load %arg8[%c0_18, %c0_19, %c0_20] : memref<2x8x32xf32, #tpu.memory_space<vmem>>, vector<1x8x32xf32>
    %15 = vector.shape_cast %14 : vector<1x8x32xf32> to vector<8x32xf32>
    %c1_21 = arith.constant 1 : index
    %c0_22 = arith.constant 0 : index
    %c0_23 = arith.constant 0 : index
    %16 = vector.load %arg8[%c1_21, %c0_22, %c0_23] : memref<2x8x32xf32, #tpu.memory_space<vmem>>, vector<1x8x32xf32>
    %17 = vector.shape_cast %16 : vector<1x8x32xf32> to vector<8x32xf32>
    %18 = vector.extract_strided_slice %9 {offsets = [0, 0], sizes = [8, 128], strides = [1, 1]} : vector<64x128xf32> to vector<8x128xf32>
    %cst_24 = arith.constant dense<0.000000e+00> : vector<8x128xf32>
    %19 = tpu.matmul %11, %2, %cst_24 {dimension_numbers = #tpu.dot_dimension_numbers<[1], [0], [0], [1], [0, 0, 1, 1], [], []>} : vector<8x32xf32>, vector<32x128xf32>, vector<8x128xf32> -> vector<8x128xf32>
    %20 = arith.addf %18, %19 : vector<8x128xf32>
    %cst_25 = arith.constant 5.000000e-01 : f32
    %21 = vector.broadcast %cst_25 : f32 to vector<8x128xf32>
    %22 = arith.mulf %21, %20 : vector<8x128xf32>
    %23 = math.tanh %22 : vector<8x128xf32>
    %cst_26 = arith.constant 5.000000e-01 : f32
    %24 = vector.broadcast %cst_26 : f32 to vector<8x128xf32>
    %25 = arith.mulf %24, %23 : vector<8x128xf32>
    %cst_27 = arith.constant 5.000000e-01 : f32
    %26 = vector.broadcast %cst_27 : f32 to vector<8x128xf32>
    %27 = arith.addf %25, %26 : vector<8x128xf32>
    %28 = math.tanh %20 : vector<8x128xf32>
    %29 = vector.extract_strided_slice %27 {offsets = [0, 0], sizes = [8, 32], strides = [1, 1]} : vector<8x128xf32> to vector<8x32xf32>
    %30 = vector.extract_strided_slice %27 {offsets = [0, 32], sizes = [8, 32], strides = [1, 1]} : vector<8x128xf32> to vector<8x32xf32>
    %31 = vector.extract_strided_slice %28 {offsets = [0, 64], sizes = [8, 32], strides = [1, 1]} : vector<8x128xf32> to vector<8x32xf32>
    %32 = vector.extract_strided_slice %27 {offsets = [0, 96], sizes = [8, 32], strides = [1, 1]} : vector<8x128xf32> to vector<8x32xf32>
    %33 = arith.mulf %30, %15 : vector<8x32xf32>
    %34 = arith.mulf %29, %31 : vector<8x32xf32>
    %35 = arith.addf %33, %34 : vector<8x32xf32>
    %36 = math.tanh %35 : vector<8x32xf32>
    %37 = arith.mulf %32, %36 : vector<8x32xf32>
    %cst_28 = arith.constant dense<0.000000e+00> : vector<8x128xf32>
    %38 = tpu.matmul %37, %1, %cst_28 {dimension_numbers = #tpu.dot_dimension_numbers<[1], [0], [0], [1], [0, 0, 1, 1], [], []>} : vector<8x32xf32>, vector<32x128xf32>, vector<8x128xf32> -> vector<8x128xf32>
    %39 = vector.broadcast %5 : vector<1x128xf32> to vector<8x128xf32>
    %40 = arith.addf %38, %39 : vector<8x128xf32>
    %cst_29 = arith.constant dense<0.000000e+00> : vector<8x128xf32>
    %41 = tpu.matmul %13, %3, %cst_29 {dimension_numbers = #tpu.dot_dimension_numbers<[1], [0], [0], [1], [0, 0, 1, 1], [], []>} : vector<8x32xf32>, vector<32x128xf32>, vector<8x128xf32> -> vector<8x128xf32>
    %42 = arith.addf %40, %41 : vector<8x128xf32>
    %cst_30 = arith.constant 5.000000e-01 : f32
    %43 = vector.broadcast %cst_30 : f32 to vector<8x128xf32>
    %44 = arith.mulf %43, %42 : vector<8x128xf32>
    %45 = math.tanh %44 : vector<8x128xf32>
    %cst_31 = arith.constant 5.000000e-01 : f32
    %46 = vector.broadcast %cst_31 : f32 to vector<8x128xf32>
    %47 = arith.mulf %46, %45 : vector<8x128xf32>
    %cst_32 = arith.constant 5.000000e-01 : f32
    %48 = vector.broadcast %cst_32 : f32 to vector<8x128xf32>
    %49 = arith.addf %47, %48 : vector<8x128xf32>
    %50 = math.tanh %42 : vector<8x128xf32>
    %51 = vector.extract_strided_slice %49 {offsets = [0, 0], sizes = [8, 32], strides = [1, 1]} : vector<8x128xf32> to vector<8x32xf32>
    %52 = vector.extract_strided_slice %49 {offsets = [0, 32], sizes = [8, 32], strides = [1, 1]} : vector<8x128xf32> to vector<8x32xf32>
    %53 = vector.extract_strided_slice %50 {offsets = [0, 64], sizes = [8, 32], strides = [1, 1]} : vector<8x128xf32> to vector<8x32xf32>
    %54 = vector.extract_strided_slice %49 {offsets = [0, 96], sizes = [8, 32], strides = [1, 1]} : vector<8x128xf32> to vector<8x32xf32>
    %55 = arith.mulf %52, %17 : vector<8x32xf32>
    %56 = arith.mulf %51, %53 : vector<8x32xf32>
    %57 = arith.addf %55, %56 : vector<8x32xf32>
    %58 = math.tanh %57 : vector<8x32xf32>
    %59 = arith.mulf %54, %58 : vector<8x32xf32>
    %c0_33 = arith.constant 0 : index
    %c0_34 = arith.constant 0 : index
    %60 = vector.load %arg9[%c0_33, %c0_34] : memref<8x256xf32, #tpu.memory_space<vmem>>, vector<8x32xf32>
    tpu.vector_store %arg9[%c0_33, %c0_34], %59 {strides = array<i32>} : memref<8x256xf32, #tpu.memory_space<vmem>>, vector<8x32xf32>,
    %61 = vector.extract_strided_slice %9 {offsets = [8, 0], sizes = [8, 128], strides = [1, 1]} : vector<64x128xf32> to vector<8x128xf32>
    %cst_35 = arith.constant dense<0.000000e+00> : vector<8x128xf32>
    %62 = tpu.matmul %37, %2, %cst_35 {dimension_numbers = #tpu.dot_dimension_numbers<[1], [0], [0], [1], [0, 0, 1, 1], [], []>} : vector<8x32xf32>, vector<32x128xf32>, vector<8x128xf32> -> vector<8x128xf32>
    %63 = arith.addf %61, %62 : vector<8x128xf32>
    %cst_36 = arith.constant 5.000000e-01 : f32
    %64 = vector.broadcast %cst_36 : f32 to vector<8x128xf32>
    %65 = arith.mulf %64, %63 : vector<8x128xf32>
    %66 = math.tanh %65 : vector<8x128xf32>
    %cst_37 = arith.constant 5.000000e-01 : f32
    %67 = vector.broadcast %cst_37 : f32 to vector<8x128xf32>
    %68 = arith.mulf %67, %66 : vector<8x128xf32>
    %cst_38 = arith.constant 5.000000e-01 : f32
    %69 = vector.broadcast %cst_38 : f32 to vector<8x128xf32>
    %70 = arith.addf %68, %69 : vector<8x128xf32>
    %71 = math.tanh %63 : vector<8x128xf32>
    %72 = vector.extract_strided_slice %70 {offsets = [0, 0], sizes = [8, 32], strides = [1, 1]} : vector<8x128xf32> to vector<8x32xf32>
    %73 = vector.extract_strided_slice %70 {offsets = [0, 32], sizes = [8, 32], strides = [1, 1]} : vector<8x128xf32> to vector<8x32xf32>
    %74 = vector.extract_strided_slice %71 {offsets = [0, 64], sizes = [8, 32], strides = [1, 1]} : vector<8x128xf32> to vector<8x32xf32>
    %75 = vector.extract_strided_slice %70 {offsets = [0, 96], sizes = [8, 32], strides = [1, 1]} : vector<8x128xf32> to vector<8x32xf32>
    %76 = arith.mulf %73, %35 : vector<8x32xf32>
    %77 = arith.mulf %72, %74 : vector<8x32xf32>
    %78 = arith.addf %76, %77 : vector<8x32xf32>
    %79 = math.tanh %78 : vector<8x32xf32>
    %80 = arith.mulf %75, %79 : vector<8x32xf32>
    %cst_39 = arith.constant dense<0.000000e+00> : vector<8x128xf32>
    %81 = tpu.matmul %80, %1, %cst_39 {dimension_numbers = #tpu.dot_dimension_numbers<[1], [0], [0], [1], [0, 0, 1, 1], [], []>} : vector<8x32xf32>, vector<32x128xf32>, vector<8x128xf32> -> vector<8x128xf32>
    %82 = vector.broadcast %5 : vector<1x128xf32> to vector<8x128xf32>
    %83 = arith.addf %81, %82 : vector<8x128xf32>
    %cst_40 = arith.constant dense<0.000000e+00> : vector<8x128xf32>
    %84 = tpu.matmul %59, %3, %cst_40 {dimension_numbers = #tpu.dot_dimension_numbers<[1], [0], [0], [1], [0, 0, 1, 1], [], []>} : vector<8x32xf32>, vector<32x128xf32>, vector<8x128xf32> -> vector<8x128xf32>
    %85 = arith.addf %83, %84 : vector<8x128xf32>
    %cst_41 = arith.constant 5.000000e-01 : f32
    %86 = vector.broadcast %cst_41 : f32 to vector<8x128xf32>
    %87 = arith.mulf %86, %85 : vector<8x128xf32>
    %88 = math.tanh %87 : vector<8x128xf32>
    %cst_42 = arith.constant 5.000000e-01 : f32
    %89 = vector.broadcast %cst_42 : f32 to vector<8x128xf32>
    %90 = arith.mulf %89, %88 : vector<8x128xf32>
    %cst_43 = arith.constant 5.000000e-01 : f32
    %91 = vector.broadcast %cst_43 : f32 to vector<8x128xf32>
    %92 = arith.addf %90, %91 : vector<8x128xf32>
    %93 = math.tanh %85 : vector<8x128xf32>
    %94 = vector.extract_strided_slice %92 {offsets = [0, 0], sizes = [8, 32], strides = [1, 1]} : vector<8x128xf32> to vector<8x32xf32>
    %95 = vector.extract_strided_slice %92 {offsets = [0, 32], sizes = [8, 32], strides = [1, 1]} : vector<8x128xf32> to vector<8x32xf32>
    %96 = vector.extract_strided_slice %93 {offsets = [0, 64], sizes = [8, 32], strides = [1, 1]} : vector<8x128xf32> to vector<8x32xf32>
    %97 = vector.extract_strided_slice %92 {offsets = [0, 96], sizes = [8, 32], strides = [1, 1]} : vector<8x128xf32> to vector<8x32xf32>
    %98 = arith.mulf %95, %57 : vector<8x32xf32>
    %99 = arith.mulf %94, %96 : vector<8x32xf32>
    %100 = arith.addf %98, %99 : vector<8x32xf32>
    %101 = math.tanh %100 : vector<8x32xf32>
    %102 = arith.mulf %97, %101 : vector<8x32xf32>
    %c0_44 = arith.constant 0 : index
    %c32 = arith.constant 32 : index
    %103 = vector.load %arg9[%c0_44, %c32] : memref<8x256xf32, #tpu.memory_space<vmem>>, vector<8x32xf32>
    tpu.vector_store %arg9[%c0_44, %c32], %102 {strides = array<i32>} : memref<8x256xf32, #tpu.memory_space<vmem>>, vector<8x32xf32>,
    %104 = vector.extract_strided_slice %9 {offsets = [16, 0], sizes = [8, 128], strides = [1, 1]} : vector<64x128xf32> to vector<8x128xf32>
    %cst_45 = arith.constant dense<0.000000e+00> : vector<8x128xf32>
    %105 = tpu.matmul %80, %2, %cst_45 {dimension_numbers = #tpu.dot_dimension_numbers<[1], [0], [0], [1], [0, 0, 1, 1], [], []>} : vector<8x32xf32>, vector<32x128xf32>, vector<8x128xf32> -> vector<8x128xf32>
    %106 = arith.addf %104, %105 : vector<8x128xf32>
    %cst_46 = arith.constant 5.000000e-01 : f32
    %107 = vector.broadcast %cst_46 : f32 to vector<8x128xf32>
    %108 = arith.mulf %107, %106 : vector<8x128xf32>
    %109 = math.tanh %108 : vector<8x128xf32>
    %cst_47 = arith.constant 5.000000e-01 : f32
    %110 = vector.broadcast %cst_47 : f32 to vector<8x128xf32>
    %111 = arith.mulf %110, %109 : vector<8x128xf32>
    %cst_48 = arith.constant 5.000000e-01 : f32
    %112 = vector.broadcast %cst_48 : f32 to vector<8x128xf32>
    %113 = arith.addf %111, %112 : vector<8x128xf32>
    %114 = math.tanh %106 : vector<8x128xf32>
    %115 = vector.extract_strided_slice %113 {offsets = [0, 0], sizes = [8, 32], strides = [1, 1]} : vector<8x128xf32> to vector<8x32xf32>
    %116 = vector.extract_strided_slice %113 {offsets = [0, 32], sizes = [8, 32], strides = [1, 1]} : vector<8x128xf32> to vector<8x32xf32>
    %117 = vector.extract_strided_slice %114 {offsets = [0, 64], sizes = [8, 32], strides = [1, 1]} : vector<8x128xf32> to vector<8x32xf32>
    %118 = vector.extract_strided_slice %113 {offsets = [0, 96], sizes = [8, 32], strides = [1, 1]} : vector<8x128xf32> to vector<8x32xf32>
    %119 = arith.mulf %116, %78 : vector<8x32xf32>
    %120 = arith.mulf %115, %117 : vector<8x32xf32>
    %121 = arith.addf %119, %120 : vector<8x32xf32>
    %122 = math.tanh %121 : vector<8x32xf32>
    %123 = arith.mulf %118, %122 : vector<8x32xf32>
    %cst_49 = arith.constant dense<0.000000e+00> : vector<8x128xf32>
    %124 = tpu.matmul %123, %1, %cst_49 {dimension_numbers = #tpu.dot_dimension_numbers<[1], [0], [0], [1], [0, 0, 1, 1], [], []>} : vector<8x32xf32>, vector<32x128xf32>, vector<8x128xf32> -> vector<8x128xf32>
    %125 = vector.broadcast %5 : vector<1x128xf32> to vector<8x128xf32>
    %126 = arith.addf %124, %125 : vector<8x128xf32>
    %cst_50 = arith.constant dense<0.000000e+00> : vector<8x128xf32>
    %127 = tpu.matmul %102, %3, %cst_50 {dimension_numbers = #tpu.dot_dimension_numbers<[1], [0], [0], [1], [0, 0, 1, 1], [], []>} : vector<8x32xf32>, vector<32x128xf32>, vector<8x128xf32> -> vector<8x128xf32>
    %128 = arith.addf %126, %127 : vector<8x128xf32>
    %cst_51 = arith.constant 5.000000e-01 : f32
    %129 = vector.broadcast %cst_51 : f32 to vector<8x128xf32>
    %130 = arith.mulf %129, %128 : vector<8x128xf32>
    %131 = math.tanh %130 : vector<8x128xf32>
    %cst_52 = arith.constant 5.000000e-01 : f32
    %132 = vector.broadcast %cst_52 : f32 to vector<8x128xf32>
    %133 = arith.mulf %132, %131 : vector<8x128xf32>
    %cst_53 = arith.constant 5.000000e-01 : f32
    %134 = vector.broadcast %cst_53 : f32 to vector<8x128xf32>
    %135 = arith.addf %133, %134 : vector<8x128xf32>
    %136 = math.tanh %128 : vector<8x128xf32>
    %137 = vector.extract_strided_slice %135 {offsets = [0, 0], sizes = [8, 32], strides = [1, 1]} : vector<8x128xf32> to vector<8x32xf32>
    %138 = vector.extract_strided_slice %135 {offsets = [0, 32], sizes = [8, 32], strides = [1, 1]} : vector<8x128xf32> to vector<8x32xf32>
    %139 = vector.extract_strided_slice %136 {offsets = [0, 64], sizes = [8, 32], strides = [1, 1]} : vector<8x128xf32> to vector<8x32xf32>
    %140 = vector.extract_strided_slice %135 {offsets = [0, 96], sizes = [8, 32], strides = [1, 1]} : vector<8x128xf32> to vector<8x32xf32>
    %141 = arith.mulf %138, %100 : vector<8x32xf32>
    %142 = arith.mulf %137, %139 : vector<8x32xf32>
    %143 = arith.addf %141, %142 : vector<8x32xf32>
    %144 = math.tanh %143 : vector<8x32xf32>
    %145 = arith.mulf %140, %144 : vector<8x32xf32>
    %c0_54 = arith.constant 0 : index
    %c64 = arith.constant 64 : index
    %146 = vector.load %arg9[%c0_54, %c64] : memref<8x256xf32, #tpu.memory_space<vmem>>, vector<8x32xf32>
    tpu.vector_store %arg9[%c0_54, %c64], %145 {strides = array<i32>} : memref<8x256xf32, #tpu.memory_space<vmem>>, vector<8x32xf32>,
    %147 = vector.extract_strided_slice %9 {offsets = [24, 0], sizes = [8, 128], strides = [1, 1]} : vector<64x128xf32> to vector<8x128xf32>
    %cst_55 = arith.constant dense<0.000000e+00> : vector<8x128xf32>
    %148 = tpu.matmul %123, %2, %cst_55 {dimension_numbers = #tpu.dot_dimension_numbers<[1], [0], [0], [1], [0, 0, 1, 1], [], []>} : vector<8x32xf32>, vector<32x128xf32>, vector<8x128xf32> -> vector<8x128xf32>
    %149 = arith.addf %147, %148 : vector<8x128xf32>
    %cst_56 = arith.constant 5.000000e-01 : f32
    %150 = vector.broadcast %cst_56 : f32 to vector<8x128xf32>
    %151 = arith.mulf %150, %149 : vector<8x128xf32>
    %152 = math.tanh %151 : vector<8x128xf32>
    %cst_57 = arith.constant 5.000000e-01 : f32
    %153 = vector.broadcast %cst_57 : f32 to vector<8x128xf32>
    %154 = arith.mulf %153, %152 : vector<8x128xf32>
    %cst_58 = arith.constant 5.000000e-01 : f32
    %155 = vector.broadcast %cst_58 : f32 to vector<8x128xf32>
    %156 = arith.addf %154, %155 : vector<8x128xf32>
    %157 = math.tanh %149 : vector<8x128xf32>
    %158 = vector.extract_strided_slice %156 {offsets = [0, 0], sizes = [8, 32], strides = [1, 1]} : vector<8x128xf32> to vector<8x32xf32>
    %159 = vector.extract_strided_slice %156 {offsets = [0, 32], sizes = [8, 32], strides = [1, 1]} : vector<8x128xf32> to vector<8x32xf32>
    %160 = vector.extract_strided_slice %157 {offsets = [0, 64], sizes = [8, 32], strides = [1, 1]} : vector<8x128xf32> to vector<8x32xf32>
    %161 = vector.extract_strided_slice %156 {offsets = [0, 96], sizes = [8, 32], strides = [1, 1]} : vector<8x128xf32> to vector<8x32xf32>
    %162 = arith.mulf %159, %121 : vector<8x32xf32>
    %163 = arith.mulf %158, %160 : vector<8x32xf32>
    %164 = arith.addf %162, %163 : vector<8x32xf32>
    %165 = math.tanh %164 : vector<8x32xf32>
    %166 = arith.mulf %161, %165 : vector<8x32xf32>
    %cst_59 = arith.constant dense<0.000000e+00> : vector<8x128xf32>
    %167 = tpu.matmul %166, %1, %cst_59 {dimension_numbers = #tpu.dot_dimension_numbers<[1], [0], [0], [1], [0, 0, 1, 1], [], []>} : vector<8x32xf32>, vector<32x128xf32>, vector<8x128xf32> -> vector<8x128xf32>
    %168 = vector.broadcast %5 : vector<1x128xf32> to vector<8x128xf32>
    %169 = arith.addf %167, %168 : vector<8x128xf32>
    %cst_60 = arith.constant dense<0.000000e+00> : vector<8x128xf32>
    %170 = tpu.matmul %145, %3, %cst_60 {dimension_numbers = #tpu.dot_dimension_numbers<[1], [0], [0], [1], [0, 0, 1, 1], [], []>} : vector<8x32xf32>, vector<32x128xf32>, vector<8x128xf32> -> vector<8x128xf32>
    %171 = arith.addf %169, %170 : vector<8x128xf32>
    %cst_61 = arith.constant 5.000000e-01 : f32
    %172 = vector.broadcast %cst_61 : f32 to vector<8x128xf32>
    %173 = arith.mulf %172, %171 : vector<8x128xf32>
    %174 = math.tanh %173 : vector<8x128xf32>
    %cst_62 = arith.constant 5.000000e-01 : f32
    %175 = vector.broadcast %cst_62 : f32 to vector<8x128xf32>
    %176 = arith.mulf %175, %174 : vector<8x128xf32>
    %cst_63 = arith.constant 5.000000e-01 : f32
    %177 = vector.broadcast %cst_63 : f32 to vector<8x128xf32>
    %178 = arith.addf %176, %177 : vector<8x128xf32>
    %179 = math.tanh %171 : vector<8x128xf32>
    %180 = vector.extract_strided_slice %178 {offsets = [0, 0], sizes = [8, 32], strides = [1, 1]} : vector<8x128xf32> to vector<8x32xf32>
    %181 = vector.extract_strided_slice %178 {offsets = [0, 32], sizes = [8, 32], strides = [1, 1]} : vector<8x128xf32> to vector<8x32xf32>
    %182 = vector.extract_strided_slice %179 {offsets = [0, 64], sizes = [8, 32], strides = [1, 1]} : vector<8x128xf32> to vector<8x32xf32>
    %183 = vector.extract_strided_slice %178 {offsets = [0, 96], sizes = [8, 32], strides = [1, 1]} : vector<8x128xf32> to vector<8x32xf32>
    %184 = arith.mulf %181, %143 : vector<8x32xf32>
    %185 = arith.mulf %180, %182 : vector<8x32xf32>
    %186 = arith.addf %184, %185 : vector<8x32xf32>
    %187 = math.tanh %186 : vector<8x32xf32>
    %188 = arith.mulf %183, %187 : vector<8x32xf32>
    %c0_64 = arith.constant 0 : index
    %c96 = arith.constant 96 : index
    %189 = vector.load %arg9[%c0_64, %c96] : memref<8x256xf32, #tpu.memory_space<vmem>>, vector<8x32xf32>
    tpu.vector_store %arg9[%c0_64, %c96], %188 {strides = array<i32>} : memref<8x256xf32, #tpu.memory_space<vmem>>, vector<8x32xf32>,
    %190 = vector.extract_strided_slice %9 {offsets = [32, 0], sizes = [8, 128], strides = [1, 1]} : vector<64x128xf32> to vector<8x128xf32>
    %cst_65 = arith.constant dense<0.000000e+00> : vector<8x128xf32>
    %191 = tpu.matmul %166, %2, %cst_65 {dimension_numbers = #tpu.dot_dimension_numbers<[1], [0], [0], [1], [0, 0, 1, 1], [], []>} : vector<8x32xf32>, vector<32x128xf32>, vector<8x128xf32> -> vector<8x128xf32>
    %192 = arith.addf %190, %191 : vector<8x128xf32>
    %cst_66 = arith.constant 5.000000e-01 : f32
    %193 = vector.broadcast %cst_66 : f32 to vector<8x128xf32>
    %194 = arith.mulf %193, %192 : vector<8x128xf32>
    %195 = math.tanh %194 : vector<8x128xf32>
    %cst_67 = arith.constant 5.000000e-01 : f32
    %196 = vector.broadcast %cst_67 : f32 to vector<8x128xf32>
    %197 = arith.mulf %196, %195 : vector<8x128xf32>
    %cst_68 = arith.constant 5.000000e-01 : f32
    %198 = vector.broadcast %cst_68 : f32 to vector<8x128xf32>
    %199 = arith.addf %197, %198 : vector<8x128xf32>
    %200 = math.tanh %192 : vector<8x128xf32>
    %201 = vector.extract_strided_slice %199 {offsets = [0, 0], sizes = [8, 32], strides = [1, 1]} : vector<8x128xf32> to vector<8x32xf32>
    %202 = vector.extract_strided_slice %199 {offsets = [0, 32], sizes = [8, 32], strides = [1, 1]} : vector<8x128xf32> to vector<8x32xf32>
    %203 = vector.extract_strided_slice %200 {offsets = [0, 64], sizes = [8, 32], strides = [1, 1]} : vector<8x128xf32> to vector<8x32xf32>
    %204 = vector.extract_strided_slice %199 {offsets = [0, 96], sizes = [8, 32], strides = [1, 1]} : vector<8x128xf32> to vector<8x32xf32>
    %205 = arith.mulf %202, %164 : vector<8x32xf32>
    %206 = arith.mulf %201, %203 : vector<8x32xf32>
    %207 = arith.addf %205, %206 : vector<8x32xf32>
    %208 = math.tanh %207 : vector<8x32xf32>
    %209 = arith.mulf %204, %208 : vector<8x32xf32>
    %cst_69 = arith.constant dense<0.000000e+00> : vector<8x128xf32>
    %210 = tpu.matmul %209, %1, %cst_69 {dimension_numbers = #tpu.dot_dimension_numbers<[1], [0], [0], [1], [0, 0, 1, 1], [], []>} : vector<8x32xf32>, vector<32x128xf32>, vector<8x128xf32> -> vector<8x128xf32>
    %211 = vector.broadcast %5 : vector<1x128xf32> to vector<8x128xf32>
    %212 = arith.addf %210, %211 : vector<8x128xf32>
    %cst_70 = arith.constant dense<0.000000e+00> : vector<8x128xf32>
    %213 = tpu.matmul %188, %3, %cst_70 {dimension_numbers = #tpu.dot_dimension_numbers<[1], [0], [0], [1], [0, 0, 1, 1], [], []>} : vector<8x32xf32>, vector<32x128xf32>, vector<8x128xf32> -> vector<8x128xf32>
    %214 = arith.addf %212, %213 : vector<8x128xf32>
    %cst_71 = arith.constant 5.000000e-01 : f32
    %215 = vector.broadcast %cst_71 : f32 to vector<8x128xf32>
    %216 = arith.mulf %215, %214 : vector<8x128xf32>
    %217 = math.tanh %216 : vector<8x128xf32>
    %cst_72 = arith.constant 5.000000e-01 : f32
    %218 = vector.broadcast %cst_72 : f32 to vector<8x128xf32>
    %219 = arith.mulf %218, %217 : vector<8x128xf32>
    %cst_73 = arith.constant 5.000000e-01 : f32
    %220 = vector.broadcast %cst_73 : f32 to vector<8x128xf32>
    %221 = arith.addf %219, %220 : vector<8x128xf32>
    %222 = math.tanh %214 : vector<8x128xf32>
    %223 = vector.extract_strided_slice %221 {offsets = [0, 0], sizes = [8, 32], strides = [1, 1]} : vector<8x128xf32> to vector<8x32xf32>
    %224 = vector.extract_strided_slice %221 {offsets = [0, 32], sizes = [8, 32], strides = [1, 1]} : vector<8x128xf32> to vector<8x32xf32>
    %225 = vector.extract_strided_slice %222 {offsets = [0, 64], sizes = [8, 32], strides = [1, 1]} : vector<8x128xf32> to vector<8x32xf32>
    %226 = vector.extract_strided_slice %221 {offsets = [0, 96], sizes = [8, 32], strides = [1, 1]} : vector<8x128xf32> to vector<8x32xf32>
    %227 = arith.mulf %224, %186 : vector<8x32xf32>
    %228 = arith.mulf %223, %225 : vector<8x32xf32>
    %229 = arith.addf %227, %228 : vector<8x32xf32>
    %230 = math.tanh %229 : vector<8x32xf32>
    %231 = arith.mulf %226, %230 : vector<8x32xf32>
    %c0_74 = arith.constant 0 : index
    %c128 = arith.constant 128 : index
    %232 = vector.load %arg9[%c0_74, %c128] : memref<8x256xf32, #tpu.memory_space<vmem>>, vector<8x32xf32>
    tpu.vector_store %arg9[%c0_74, %c128], %231 {strides = array<i32>} : memref<8x256xf32, #tpu.memory_space<vmem>>, vector<8x32xf32>,
    %233 = vector.extract_strided_slice %9 {offsets = [40, 0], sizes = [8, 128], strides = [1, 1]} : vector<64x128xf32> to vector<8x128xf32>
    %cst_75 = arith.constant dense<0.000000e+00> : vector<8x128xf32>
    %234 = tpu.matmul %209, %2, %cst_75 {dimension_numbers = #tpu.dot_dimension_numbers<[1], [0], [0], [1], [0, 0, 1, 1], [], []>} : vector<8x32xf32>, vector<32x128xf32>, vector<8x128xf32> -> vector<8x128xf32>
    %235 = arith.addf %233, %234 : vector<8x128xf32>
    %cst_76 = arith.constant 5.000000e-01 : f32
    %236 = vector.broadcast %cst_76 : f32 to vector<8x128xf32>
    %237 = arith.mulf %236, %235 : vector<8x128xf32>
    %238 = math.tanh %237 : vector<8x128xf32>
    %cst_77 = arith.constant 5.000000e-01 : f32
    %239 = vector.broadcast %cst_77 : f32 to vector<8x128xf32>
    %240 = arith.mulf %239, %238 : vector<8x128xf32>
    %cst_78 = arith.constant 5.000000e-01 : f32
    %241 = vector.broadcast %cst_78 : f32 to vector<8x128xf32>
    %242 = arith.addf %240, %241 : vector<8x128xf32>
    %243 = math.tanh %235 : vector<8x128xf32>
    %244 = vector.extract_strided_slice %242 {offsets = [0, 0], sizes = [8, 32], strides = [1, 1]} : vector<8x128xf32> to vector<8x32xf32>
    %245 = vector.extract_strided_slice %242 {offsets = [0, 32], sizes = [8, 32], strides = [1, 1]} : vector<8x128xf32> to vector<8x32xf32>
    %246 = vector.extract_strided_slice %243 {offsets = [0, 64], sizes = [8, 32], strides = [1, 1]} : vector<8x128xf32> to vector<8x32xf32>
    %247 = vector.extract_strided_slice %242 {offsets = [0, 96], sizes = [8, 32], strides = [1, 1]} : vector<8x128xf32> to vector<8x32xf32>
    %248 = arith.mulf %245, %207 : vector<8x32xf32>
    %249 = arith.mulf %244, %246 : vector<8x32xf32>
    %250 = arith.addf %248, %249 : vector<8x32xf32>
    %251 = math.tanh %250 : vector<8x32xf32>
    %252 = arith.mulf %247, %251 : vector<8x32xf32>
    %cst_79 = arith.constant dense<0.000000e+00> : vector<8x128xf32>
    %253 = tpu.matmul %252, %1, %cst_79 {dimension_numbers = #tpu.dot_dimension_numbers<[1], [0], [0], [1], [0, 0, 1, 1], [], []>} : vector<8x32xf32>, vector<32x128xf32>, vector<8x128xf32> -> vector<8x128xf32>
    %254 = vector.broadcast %5 : vector<1x128xf32> to vector<8x128xf32>
    %255 = arith.addf %253, %254 : vector<8x128xf32>
    %cst_80 = arith.constant dense<0.000000e+00> : vector<8x128xf32>
    %256 = tpu.matmul %231, %3, %cst_80 {dimension_numbers = #tpu.dot_dimension_numbers<[1], [0], [0], [1], [0, 0, 1, 1], [], []>} : vector<8x32xf32>, vector<32x128xf32>, vector<8x128xf32> -> vector<8x128xf32>
    %257 = arith.addf %255, %256 : vector<8x128xf32>
    %cst_81 = arith.constant 5.000000e-01 : f32
    %258 = vector.broadcast %cst_81 : f32 to vector<8x128xf32>
    %259 = arith.mulf %258, %257 : vector<8x128xf32>
    %260 = math.tanh %259 : vector<8x128xf32>
    %cst_82 = arith.constant 5.000000e-01 : f32
    %261 = vector.broadcast %cst_82 : f32 to vector<8x128xf32>
    %262 = arith.mulf %261, %260 : vector<8x128xf32>
    %cst_83 = arith.constant 5.000000e-01 : f32
    %263 = vector.broadcast %cst_83 : f32 to vector<8x128xf32>
    %264 = arith.addf %262, %263 : vector<8x128xf32>
    %265 = math.tanh %257 : vector<8x128xf32>
    %266 = vector.extract_strided_slice %264 {offsets = [0, 0], sizes = [8, 32], strides = [1, 1]} : vector<8x128xf32> to vector<8x32xf32>
    %267 = vector.extract_strided_slice %264 {offsets = [0, 32], sizes = [8, 32], strides = [1, 1]} : vector<8x128xf32> to vector<8x32xf32>
    %268 = vector.extract_strided_slice %265 {offsets = [0, 64], sizes = [8, 32], strides = [1, 1]} : vector<8x128xf32> to vector<8x32xf32>
    %269 = vector.extract_strided_slice %264 {offsets = [0, 96], sizes = [8, 32], strides = [1, 1]} : vector<8x128xf32> to vector<8x32xf32>
    %270 = arith.mulf %267, %229 : vector<8x32xf32>
    %271 = arith.mulf %266, %268 : vector<8x32xf32>
    %272 = arith.addf %270, %271 : vector<8x32xf32>
    %273 = math.tanh %272 : vector<8x32xf32>
    %274 = arith.mulf %269, %273 : vector<8x32xf32>
    %c0_84 = arith.constant 0 : index
    %c160 = arith.constant 160 : index
    %275 = vector.load %arg9[%c0_84, %c160] : memref<8x256xf32, #tpu.memory_space<vmem>>, vector<8x32xf32>
    tpu.vector_store %arg9[%c0_84, %c160], %274 {strides = array<i32>} : memref<8x256xf32, #tpu.memory_space<vmem>>, vector<8x32xf32>,
    %276 = vector.extract_strided_slice %9 {offsets = [48, 0], sizes = [8, 128], strides = [1, 1]} : vector<64x128xf32> to vector<8x128xf32>
    %cst_85 = arith.constant dense<0.000000e+00> : vector<8x128xf32>
    %277 = tpu.matmul %252, %2, %cst_85 {dimension_numbers = #tpu.dot_dimension_numbers<[1], [0], [0], [1], [0, 0, 1, 1], [], []>} : vector<8x32xf32>, vector<32x128xf32>, vector<8x128xf32> -> vector<8x128xf32>
    %278 = arith.addf %276, %277 : vector<8x128xf32>
    %cst_86 = arith.constant 5.000000e-01 : f32
    %279 = vector.broadcast %cst_86 : f32 to vector<8x128xf32>
    %280 = arith.mulf %279, %278 : vector<8x128xf32>
    %281 = math.tanh %280 : vector<8x128xf32>
    %cst_87 = arith.constant 5.000000e-01 : f32
    %282 = vector.broadcast %cst_87 : f32 to vector<8x128xf32>
    %283 = arith.mulf %282, %281 : vector<8x128xf32>
    %cst_88 = arith.constant 5.000000e-01 : f32
    %284 = vector.broadcast %cst_88 : f32 to vector<8x128xf32>
    %285 = arith.addf %283, %284 : vector<8x128xf32>
    %286 = math.tanh %278 : vector<8x128xf32>
    %287 = vector.extract_strided_slice %285 {offsets = [0, 0], sizes = [8, 32], strides = [1, 1]} : vector<8x128xf32> to vector<8x32xf32>
    %288 = vector.extract_strided_slice %285 {offsets = [0, 32], sizes = [8, 32], strides = [1, 1]} : vector<8x128xf32> to vector<8x32xf32>
    %289 = vector.extract_strided_slice %286 {offsets = [0, 64], sizes = [8, 32], strides = [1, 1]} : vector<8x128xf32> to vector<8x32xf32>
    %290 = vector.extract_strided_slice %285 {offsets = [0, 96], sizes = [8, 32], strides = [1, 1]} : vector<8x128xf32> to vector<8x32xf32>
    %291 = arith.mulf %288, %250 : vector<8x32xf32>
    %292 = arith.mulf %287, %289 : vector<8x32xf32>
    %293 = arith.addf %291, %292 : vector<8x32xf32>
    %294 = math.tanh %293 : vector<8x32xf32>
    %295 = arith.mulf %290, %294 : vector<8x32xf32>
    %cst_89 = arith.constant dense<0.000000e+00> : vector<8x128xf32>
    %296 = tpu.matmul %295, %1, %cst_89 {dimension_numbers = #tpu.dot_dimension_numbers<[1], [0], [0], [1], [0, 0, 1, 1], [], []>} : vector<8x32xf32>, vector<32x128xf32>, vector<8x128xf32> -> vector<8x128xf32>
    %297 = vector.broadcast %5 : vector<1x128xf32> to vector<8x128xf32>
    %298 = arith.addf %296, %297 : vector<8x128xf32>
    %cst_90 = arith.constant dense<0.000000e+00> : vector<8x128xf32>
    %299 = tpu.matmul %274, %3, %cst_90 {dimension_numbers = #tpu.dot_dimension_numbers<[1], [0], [0], [1], [0, 0, 1, 1], [], []>} : vector<8x32xf32>, vector<32x128xf32>, vector<8x128xf32> -> vector<8x128xf32>
    %300 = arith.addf %298, %299 : vector<8x128xf32>
    %cst_91 = arith.constant 5.000000e-01 : f32
    %301 = vector.broadcast %cst_91 : f32 to vector<8x128xf32>
    %302 = arith.mulf %301, %300 : vector<8x128xf32>
    %303 = math.tanh %302 : vector<8x128xf32>
    %cst_92 = arith.constant 5.000000e-01 : f32
    %304 = vector.broadcast %cst_92 : f32 to vector<8x128xf32>
    %305 = arith.mulf %304, %303 : vector<8x128xf32>
    %cst_93 = arith.constant 5.000000e-01 : f32
    %306 = vector.broadcast %cst_93 : f32 to vector<8x128xf32>
    %307 = arith.addf %305, %306 : vector<8x128xf32>
    %308 = math.tanh %300 : vector<8x128xf32>
    %309 = vector.extract_strided_slice %307 {offsets = [0, 0], sizes = [8, 32], strides = [1, 1]} : vector<8x128xf32> to vector<8x32xf32>
    %310 = vector.extract_strided_slice %307 {offsets = [0, 32], sizes = [8, 32], strides = [1, 1]} : vector<8x128xf32> to vector<8x32xf32>
    %311 = vector.extract_strided_slice %308 {offsets = [0, 64], sizes = [8, 32], strides = [1, 1]} : vector<8x128xf32> to vector<8x32xf32>
    %312 = vector.extract_strided_slice %307 {offsets = [0, 96], sizes = [8, 32], strides = [1, 1]} : vector<8x128xf32> to vector<8x32xf32>
    %313 = arith.mulf %310, %272 : vector<8x32xf32>
    %314 = arith.mulf %309, %311 : vector<8x32xf32>
    %315 = arith.addf %313, %314 : vector<8x32xf32>
    %316 = math.tanh %315 : vector<8x32xf32>
    %317 = arith.mulf %312, %316 : vector<8x32xf32>
    %c0_94 = arith.constant 0 : index
    %c192 = arith.constant 192 : index
    %318 = vector.load %arg9[%c0_94, %c192] : memref<8x256xf32, #tpu.memory_space<vmem>>, vector<8x32xf32>
    tpu.vector_store %arg9[%c0_94, %c192], %317 {strides = array<i32>} : memref<8x256xf32, #tpu.memory_space<vmem>>, vector<8x32xf32>,
    %319 = vector.extract_strided_slice %9 {offsets = [56, 0], sizes = [8, 128], strides = [1, 1]} : vector<64x128xf32> to vector<8x128xf32>
    %cst_95 = arith.constant dense<0.000000e+00> : vector<8x128xf32>
    %320 = tpu.matmul %295, %2, %cst_95 {dimension_numbers = #tpu.dot_dimension_numbers<[1], [0], [0], [1], [0, 0, 1, 1], [], []>} : vector<8x32xf32>, vector<32x128xf32>, vector<8x128xf32> -> vector<8x128xf32>
    %321 = arith.addf %319, %320 : vector<8x128xf32>
    %cst_96 = arith.constant 5.000000e-01 : f32
    %322 = vector.broadcast %cst_96 : f32 to vector<8x128xf32>
    %323 = arith.mulf %322, %321 : vector<8x128xf32>
    %324 = math.tanh %323 : vector<8x128xf32>
    %cst_97 = arith.constant 5.000000e-01 : f32
    %325 = vector.broadcast %cst_97 : f32 to vector<8x128xf32>
    %326 = arith.mulf %325, %324 : vector<8x128xf32>
    %cst_98 = arith.constant 5.000000e-01 : f32
    %327 = vector.broadcast %cst_98 : f32 to vector<8x128xf32>
    %328 = arith.addf %326, %327 : vector<8x128xf32>
    %329 = math.tanh %321 : vector<8x128xf32>
    %330 = vector.extract_strided_slice %328 {offsets = [0, 0], sizes = [8, 32], strides = [1, 1]} : vector<8x128xf32> to vector<8x32xf32>
    %331 = vector.extract_strided_slice %328 {offsets = [0, 32], sizes = [8, 32], strides = [1, 1]} : vector<8x128xf32> to vector<8x32xf32>
    %332 = vector.extract_strided_slice %329 {offsets = [0, 64], sizes = [8, 32], strides = [1, 1]} : vector<8x128xf32> to vector<8x32xf32>
    %333 = vector.extract_strided_slice %328 {offsets = [0, 96], sizes = [8, 32], strides = [1, 1]} : vector<8x128xf32> to vector<8x32xf32>
    %334 = arith.mulf %331, %293 : vector<8x32xf32>
    %335 = arith.mulf %330, %332 : vector<8x32xf32>
    %336 = arith.addf %334, %335 : vector<8x32xf32>
    %337 = math.tanh %336 : vector<8x32xf32>
    %338 = arith.mulf %333, %337 : vector<8x32xf32>
    %cst_99 = arith.constant dense<0.000000e+00> : vector<8x128xf32>
    %339 = tpu.matmul %338, %1, %cst_99 {dimension_numbers = #tpu.dot_dimension_numbers<[1], [0], [0], [1], [0, 0, 1, 1], [], []>} : vector<8x32xf32>, vector<32x128xf32>, vector<8x128xf32> -> vector<8x128xf32>
    %340 = vector.broadcast %5 : vector<1x128xf32> to vector<8x128xf32>
    %341 = arith.addf %339, %340 : vector<8x128xf32>
    %cst_100 = arith.constant dense<0.000000e+00> : vector<8x128xf32>
    %342 = tpu.matmul %317, %3, %cst_100 {dimension_numbers = #tpu.dot_dimension_numbers<[1], [0], [0], [1], [0, 0, 1, 1], [], []>} : vector<8x32xf32>, vector<32x128xf32>, vector<8x128xf32> -> vector<8x128xf32>
    %343 = arith.addf %341, %342 : vector<8x128xf32>
    %cst_101 = arith.constant 5.000000e-01 : f32
    %344 = vector.broadcast %cst_101 : f32 to vector<8x128xf32>
    %345 = arith.mulf %344, %343 : vector<8x128xf32>
    %346 = math.tanh %345 : vector<8x128xf32>
    %cst_102 = arith.constant 5.000000e-01 : f32
    %347 = vector.broadcast %cst_102 : f32 to vector<8x128xf32>
    %348 = arith.mulf %347, %346 : vector<8x128xf32>
    %cst_103 = arith.constant 5.000000e-01 : f32
    %349 = vector.broadcast %cst_103 : f32 to vector<8x128xf32>
    %350 = arith.addf %348, %349 : vector<8x128xf32>
    %351 = math.tanh %343 : vector<8x128xf32>
    %352 = vector.extract_strided_slice %350 {offsets = [0, 0], sizes = [8, 32], strides = [1, 1]} : vector<8x128xf32> to vector<8x32xf32>
    %353 = vector.extract_strided_slice %350 {offsets = [0, 32], sizes = [8, 32], strides = [1, 1]} : vector<8x128xf32> to vector<8x32xf32>
    %354 = vector.extract_strided_slice %351 {offsets = [0, 64], sizes = [8, 32], strides = [1, 1]} : vector<8x128xf32> to vector<8x32xf32>
    %355 = vector.extract_strided_slice %350 {offsets = [0, 96], sizes = [8, 32], strides = [1, 1]} : vector<8x128xf32> to vector<8x32xf32>
    %356 = arith.mulf %353, %315 : vector<8x32xf32>
    %357 = arith.mulf %352, %354 : vector<8x32xf32>
    %358 = arith.addf %356, %357 : vector<8x32xf32>
    %359 = math.tanh %358 : vector<8x32xf32>
    %360 = arith.mulf %355, %359 : vector<8x32xf32>
    %c0_104 = arith.constant 0 : index
    %c224 = arith.constant 224 : index
    %361 = vector.load %arg9[%c0_104, %c224] : memref<8x256xf32, #tpu.memory_space<vmem>>, vector<8x32xf32>
    tpu.vector_store %arg9[%c0_104, %c224], %360 {strides = array<i32>} : memref<8x256xf32, #tpu.memory_space<vmem>>, vector<8x32xf32>,
    %c0_105 = arith.constant 0 : index
    %c0_106 = arith.constant 0 : index
    %362 = vector.load %arg10[%c0_105, %c0_106] : memref<8x128xf32, #tpu.memory_space<vmem>>, vector<8x32xf32>
    tpu.vector_store %arg10[%c0_105, %c0_106], %338 {strides = array<i32>} : memref<8x128xf32, #tpu.memory_space<vmem>>, vector<8x32xf32>,
    %c0_107 = arith.constant 0 : index
    %c32_108 = arith.constant 32 : index
    %363 = vector.load %arg10[%c0_107, %c32_108] : memref<8x128xf32, #tpu.memory_space<vmem>>, vector<8x32xf32>
    tpu.vector_store %arg10[%c0_107, %c32_108], %336 {strides = array<i32>} : memref<8x128xf32, #tpu.memory_space<vmem>>, vector<8x32xf32>,
    %c0_109 = arith.constant 0 : index
    %c64_110 = arith.constant 64 : index
    %364 = vector.load %arg10[%c0_109, %c64_110] : memref<8x128xf32, #tpu.memory_space<vmem>>, vector<8x32xf32>
    tpu.vector_store %arg10[%c0_109, %c64_110], %360 {strides = array<i32>} : memref<8x128xf32, #tpu.memory_space<vmem>>, vector<8x32xf32>,
    %c0_111 = arith.constant 0 : index
    %c96_112 = arith.constant 96 : index
    %365 = vector.load %arg10[%c0_111, %c96_112] : memref<8x128xf32, #tpu.memory_space<vmem>>, vector<8x32xf32>
    tpu.vector_store %arg10[%c0_111, %c96_112], %358 {strides = array<i32>} : memref<8x128xf32, #tpu.memory_space<vmem>>, vector<8x32xf32>,
    return
  }
}

</mosaic_0001>

<bundles_post_ra>
// kernel: _conversation_lstm_forward.1
= control target key start
LH: loop header
LB: loop body
LE: loop exit
PB: predicated region body
PF: predicated region fallthrough
CT: control target
= control target key end

     0   :  { %vm63_vm0 = vcmask 261120   ;;  %s1256_s13 = smov 64   ;;  %s1257_s16 = smov 32   ;;  %vm385_vm1 = vcmask 523520   ;;  %vm506_vm2 = vcmask 785920   ;;  %vm623_vm3 = vcmask 1048320   ;;  %s1744_s1 = inlined_call_operand.vmem [shape: f32[32,128], index: 1, kind: input, shape index: {}]   ;;  %s1745_s2 = inlined_call_operand.vmem [shape: f32[32,128], index: 2, kind: input, shape index: {}]   ;;  %s1746_s0 = inlined_call_operand.vmem [shape: f32[64,32], index: 0, kind: input, shape index: {}]   ;;  %s1747_s7 = inlined_call_operand.vmem [shape: f32[2,8,32], index: 7, kind: input, shape index: {}]   ;;  %s1748_s3 = inlined_call_operand.vmem [shape: f32[1,128], index: 3, kind: input, shape index: {}]   ;;  %s1749_s8 = inlined_call_operand.vmem [shape: f32[2,8,32], index: 8, kind: input, shape index: {}]   ;;  %s1750_s4 = inlined_call_operand.vmem [shape: f32[32,128], index: 4, kind: input, shape index: {}]   ;;  %s1751_s5 = inlined_call_operand.vmem [shape: f32[32,128], index: 5, kind: input, shape index: {}]   ;;  %s1752_s6 = inlined_call_operand.vmem [shape: f32[1,128], index: 6, kind: input, shape index: {}]   ;;  %s1753_s9 = inlined_call_operand.vmem [shape: f32[8,256], index: 9, kind: output, shape index: {0}]   ;;  %s1754_s10 = inlined_call_operand.vmem [shape: f32[8,128], index: 10, kind: output, shape index: {1}]  }
   0x1   :  { %v37_v0 = vld [vmem:[%s1744_s1 + $0x18] sm:$0xff]  ;;  %v36_v1 = vld [vmem:[%s1744_s1 + $0x10] sm:$0xff]  ;;  %v35_v4 = vld [vmem:[%s1744_s1 + $0x8] sm:$0xff]  ;;  %s1258_s12 = smov 96  }
   0x2   :  { %v1323_v2 = vld [vmem:[%s1745_s2 + $0x18] sm:$0xff]  ;;  %100 = vmatpush.msra.mxu0 %v37_v0  ;;  %v1329_v3 = vld [vmem:[%s1745_s2 + $0x10] sm:$0xff]  ;;  %v1337_v5 = vld [vmem:[%s1745_s2 + $0x8] sm:$0xff] }
   0x3   :  { %150 = vmatpush.msra.mxu1 %v1323_v2  ;;  %v34_v6 = vld [vmem:[%s1744_s1] sm:$0xff]  ;;  %v1385_v28 = vld [vmem:[%s1750_s4 + $0x18] sm:$0xff]  ;;  %v1390_v29 = vld [vmem:[%s1750_s4 + $0x10] sm:$0xff] }
   0x4   :  { %101 = vmatpush.msra.mxu0 %v36_v1  ;;  %v1346_v7 = vld [vmem:[%s1745_s2] sm:$0xff]  ;;  %v1395_v30 = vld [vmem:[%s1751_s5 + $0x18] sm:$0xff]  ;;  %205 = vmatpush.msra.mxu2 %v1385_v28  ;;  %v1402_v31 = vld [vmem:[%s1751_s5 + $0x10] sm:$0xff] }
   0x5   :  { %151 = vmatpush.msra.mxu1 %v1329_v3  ;;  %v52_v8 = vld [vmem:[%s1746_s0] sm:$0xff]  ;;  %228 = vmatpush.msra.mxu3 %v1395_v30  ;;  %v53_v32 = vld [vmem:[%s1746_s0 + $0x8] sm:$0xff] }
   0x6   :  { %102 = vmatpush.msra.mxu0 %v35_v4  ;;  %v129_v9 = vld [vmem:[%s1747_s7] sm:$0xff]  ;;  %v1410_v33 = vld [vmem:[%s1750_s4 + $0x8] sm:$0xff]  ;;  %206 = vmatpush.msra.mxu2 %v1390_v29 }
   0x7   :  { %152 = vmatpush.msra.mxu1 %v1337_v5  ;;  %v1369_v10 = vld [vmem:[%s1748_s3] ss:$0 sm:$0xff]  ;;  %v1416_v34 = vld [vmem:[%s1751_s5 + $0x8] sm:$0xff]  ;;  %229 = vmatpush.msra.mxu3 %v1402_v31 }
   0x8   :  { %103 = vmatpush.msra.mxu0 %v34_v6  ;;  %v132_v16 = vld [vmem:[%s1749_s8] sm:$0xff]  ;;  %207 = vmatpush.msra.mxu2 %v1410_v33  ;;  %v1129_v39 = vld [vmem:[%s1747_s7 + $0x8] sm:$0xff] }
   0x9   :  { %153 = vmatpush.msra.mxu1 %v1346_v7  ;;  %1121 = vmatmul.msk.f32.vlgmr.msra.gmra.mxu0 %vm63_vm0, %v52_v8  ;;  %v1423_v35 = vld [vmem:[%s1750_s4] sm:$0xff]  ;;  %v1130_v40 = vld [vmem:[%s1749_s8 + $0x8] sm:$0xff] }
   0xa   :  { %1131 = vmatmul.msk.f32.vlgmr.msra.gmra.mxu1 %vm63_vm0, %v129_v9  ;;  %230 = vmatpush.msra.mxu3 %v1416_v34  ;;  %v1436_v38 = vld [vmem:[%s1751_s5] sm:$0xff] }
   0xb   :  { %280 = vmatpush.msrb.mxu1 %v1323_v2  ;;  %208 = vmatpush.msra.mxu2 %v1423_v35  ;;  %v1469_v46 = vld [vmem:[%s1752_s6] ss:$0 sm:$0xff] }
   0xc   :  { %231 = vmatpush.msra.mxu3 %v1436_v38 }
   0xd   :  { %281 = vmatpush.msrb.mxu1 %v1329_v3  ;;  %328 = vmatpush.msrb.mxu2 %v1385_v28 }
   0xe   :  { %1133 = vmatmul.msk.f32.vlgmr.msra.gmra.mxu3 %vm63_vm0, %v1129_v39 }
   0xf   :  { %282 = vmatpush.msrb.mxu1 %v1337_v5  ;;  %329 = vmatpush.msrb.mxu2 %v1390_v29 }
  0x10   :  { %350 = vmatpush.msrb.mxu3 %v1395_v30 }
  0x11   :  { %283 = vmatpush.msrb.mxu1 %v1346_v7  ;;  %1122 = vmatmul.msk.f32.gmra.mxu0 %vm63_vm0, %v53_v32 }
  0x12   :  { %330 = vmatpush.msrb.mxu2 %v1410_v33  ;;  %351 = vmatpush.msrb.mxu3 %v1402_v31 }
  0x13   :  { %399 = vmatpush.msra.mxu1 %v1323_v2 }
  0x14   :  { %331 = vmatpush.msrb.mxu2 %v1423_v35  ;;  %352 = vmatpush.msrb.mxu3 %v1416_v34 }
  0x15   :  { %400 = vmatpush.msra.mxu1 %v1329_v3 }
  0x16   :  { %353 = vmatpush.msrb.mxu3 %v1436_v38 }
  0x17   :  { %401 = vmatpush.msra.mxu1 %v1337_v5 }
  0x18   :  { %471 = vmatpush.msra.mxu3 %v1395_v30 }
  0x19   :  { %402 = vmatpush.msra.mxu1 %v1346_v7 }
  0x1a   :  { %472 = vmatpush.msra.mxu3 %v1402_v31 }
  0x1c   :  { %473 = vmatpush.msra.mxu3 %v1416_v34 }
  0x1e   :  { %474 = vmatpush.msra.mxu3 %v1436_v38 }
  0x86   :  { %v105_v11 = vpop.f32.mrf.mxu0 }
  0x87   :  { %v155_v12 = vpop.f32.mrf.mxu1  ;;  %v106_v13 = vadd.f32 %v1369_v10, %v105_v11 }
  0x89   :  { %v158_v14 = vadd.f32 %v155_v12, %v106_v13 }
  0x8b   :  { %1160 = vtanh.f32 %v158_v14  ;;  %v159_v17 = vmul.f32 0.5, %v158_v14 }
  0x8d   :  { %1162 = vtanh.f32 %v159_v17  ;;  %v54_v17 = vld [vmem:[%s1746_s0 + $0x10] sm:$0xff] }
  0x8e   :  { %v108_v42 = vpop.f32.mrf.mxu0  ;;  %1123 = vmatmul.msk.f32.gmra.mxu0 %vm63_vm0, %v54_v17 }
  0x8f   :  { %v109_v43 = vadd.f32 %v1369_v10, %v108_v42 }
  0x91   :  { %v1161_v15 = vpop.eup %1160  ;;  %v233_v48 = vpop.f32.mrf.mxu3 }
  0x92   :  { %170 = vrot.lane.b32.xlu0 %v1161_v15, %s1256_s13 }
  0x93   :  { %v1163_v18 = vpop.eup %1162 }
  0x94   :  { %v161_v19 = vmul.f32 0.5, %v1163_v18 }
  0x96   :  { %v162_v20 = vadd.f32 0.5, %v161_v19 }
  0x9a   :  { %165 = vrot.lane.b32.xlu0 %v132_v16, %s1257_s16 }
 0x104   :  { %v171_v21 = vpop.permute.xlu0 %170 }
 0x105   :  { %v173_v22 = vmul.f32 %v171_v21, %v162_v20 }
 0x107   :  { %175 = vrot.lane.b32.xlu1 %v173_v22, %s1257_s16 }
 0x10b   :  { %v111_v22 = vpop.f32.mrf.mxu0 }
 0x10c   :  { %v166_v23 = vpop.permute.xlu0 %165 }
 0x10d   :  { %v168_v24 = vmul.f32 %v166_v23, %v162_v20  ;;  %v112_v23 = vadd.f32 %v1369_v10, %v111_v22 }
 0x179   :  { %v176_v25 = vpop.permute.xlu1 %175 }
 0x17a   :  { %v1378_v26 = vadd.f32 %v176_v25, %v168_v24 }
 0x17c   :  { %1164 = vtanh.f32 %v1378_v26 }
 0x182   :  { %v1165_v27 = vpop.eup %1164 }
 0x183   :  { %181 = vrot.lane.b32.xlu1 %v1165_v27, %s1256_s13 }
 0x18b   :  { %243 = vrot.lane.b32.xlu1 %v1130_v40, %s1257_s16 }
 0x1f5   :  { %v182_v36 = vpop.permute.xlu1 %181 }
 0x1f6   :  { %v184_v37 = vmul.f32 %v182_v36, %v162_v20 }
 0x1f8   :  { %189 = vrot.lane.b32.xlu2 %v184_v37, %s1257_s16 }
 0x1fd   :  { %v244_v9 = vpop.permute.xlu1 %243 }
 0x252   :  { %v190_v41 = vpop.permute.xlu2 %189 }
 0x253   :  { %1132 = vmatmul.msk.f32.vlgmr.msra.gmra.mxu2 %vm63_vm0, %v190_v41  ;;  %1134 = vmatmul.msk.f32.vlgmr.msrb.gmra.mxu1 %vm63_vm0, %v190_v41 }
 0x254   :  { %447 = vmatpush.msra.mxu2 %v1385_v28  ;;  %520 = vmatpush.msrb.mxu1 %v1323_v2 }
 0x256   :  { %448 = vmatpush.msra.mxu2 %v1390_v29  ;;  %521 = vmatpush.msrb.mxu1 %v1329_v3 }
 0x258   :  { %449 = vmatpush.msra.mxu2 %v1410_v33  ;;  %522 = vmatpush.msrb.mxu1 %v1337_v5 }
 0x25a   :  { %450 = vmatpush.msra.mxu2 %v1423_v35  ;;  %523 = vmatpush.msrb.mxu1 %v1346_v7 }
 0x2d0   :  { %v285_v44 = vpop.f32.mrf.mxu1 }
 0x2d1   :  { %v288_v45 = vadd.f32 %v285_v44, %v109_v43 }
 0x2d3   :  { %1166 = vtanh.f32 %v288_v45  ;;  %v289_v53 = vmul.f32 0.5, %v288_v45 }
 0x2d6   :  { %v210_v47 = vpop.f32.mrf.mxu2 }
 0x2d7   :  { %v211_v49 = vadd.f32 %v1469_v46, %v210_v47 }
 0x2d9   :  { %v1167_v50 = vpop.eup %1166  ;;  %v236_v51 = vadd.f32 %v233_v48, %v211_v49 }
 0x2da   :  { %296 = vrot.lane.b32.xlu2 %v1167_v50, %s1256_s13 }
 0x2db   :  { %1168 = vtanh.f32 %v236_v51  ;;  %v237_v59 = vmul.f32 0.5, %v236_v51 }
 0x2dc   :  { %1170 = vtanh.f32 %v289_v53 }
 0x2dd   :  { %1172 = vtanh.f32 %v237_v59 }
 0x2e1   :  { %v1169_v52 = vpop.eup %1168 }
 0x2e2   :  { %248 = vrot.lane.b32.xlu0 %v1169_v52, %s1256_s13  ;;  %v1171_v54 = vpop.eup %1170 }
 0x2e3   :  { %v291_v55 = vmul.f32 0.5, %v1171_v54  ;;  %v1173_v60 = vpop.eup %1172 }
 0x2e4   :  { %v239_v61 = vmul.f32 0.5, %v1173_v60 }
 0x2e5   :  { %v292_v56 = vadd.f32 0.5, %v291_v55 }
 0x2e6   :  { %v240_v62 = vadd.f32 0.5, %v239_v61 }
 0x2e7   :  { %v294_v1 = vmul.f32 %v292_v56, %v1378_v26 }
 0x2e8   :  { %v246_v11 = vmul.f32 %v244_v9, %v240_v62 }
 0x334   :  { %v297_v57 = vpop.permute.xlu2 %296 }
 0x335   :  { %v299_v58 = vmul.f32 %v297_v57, %v292_v56 }
 0x337   :  { %301 = vrot.lane.b32.xlu2 %v299_v58, %s1257_s16 }
 0x354   :  { %v249_v63 = vpop.permute.xlu0 %248 }
 0x355   :  { %v251_v0 = vmul.f32 %v249_v63, %v240_v62  ;;  %v55_v63 = vld [vmem:[%s1746_s0 + $0x18] sm:$0xff] }
 0x356   :  { %1124 = vmatmul.msk.f32.gmra.mxu0 %vm63_vm0, %v55_v63 }
 0x357   :  { %253 = vrot.lane.b32.xlu0 %v251_v0, %s1257_s16 }
 0x391   :  { %v302_v4 = vpop.permute.xlu2 %301 }
 0x392   :  { %v1477_v6 = vadd.f32 %v302_v4, %v294_v1 }
 0x394   :  { %1174 = vtanh.f32 %v1477_v6 }
 0x39a   :  { %v1175_v8 = vpop.eup %1174 }
 0x39b   :  { %307 = vrot.lane.b32.xlu1 %v1175_v8, %s1256_s13 }
 0x3c9   :  { %v254_v12 = vpop.permute.xlu0 %253 }
 0x3ca   :  { %v1481_v13 = vadd.f32 %v254_v12, %v246_v11 }
 0x3cc   :  { %1176 = vtanh.f32 %v1481_v13 }
 0x3d2   :  { %v1177_v14 = vpop.eup %1176 }
 0x3d3   :  { %259 = vrot.lane.b32.xlu2 %v1177_v14, %s1256_s13  ;;  %v114_v8 = vpop.f32.mrf.mxu0 }
 0x3d4   :  { %v115_v9 = vadd.f32 %v1369_v10, %v114_v8 }
 0x40d   :  { %v308_v15 = vpop.permute.xlu1 %307 }
 0x40e   :  { %v310_v16 = vmul.f32 %v308_v15, %v292_v56 }
 0x410   :  { %312 = vrot.lane.b32.xlu0 %v310_v16, %s1257_s16 }
 0x42d   :  { %v260_v18 = vpop.permute.xlu2 %259 }
 0x42e   :  { %v262_v19 = vmul.f32 %v260_v18, %v240_v62 }
 0x430   :  { %264 = vrot.lane.b32.xlu1 %v262_v19, %s1257_s16 }
 0x482   :  { %v313_v20 = vpop.permute.xlu0 %312 }
 0x483   :  { %1135 = vmatmul.msk.f32.vlgmr.msrb.gmra.mxu2 %vm63_vm0, %v313_v20  ;;  %1137 = vmatmul.msk.f32.vlgmr.msra.gmra.mxu1 %vm63_vm0, %v313_v20 }
 0x484   :  { %568 = vmatpush.msrb.mxu2 %v1385_v28  ;;  %637 = vmatpush.msra.mxu1 %v1323_v2 }
 0x486   :  { %569 = vmatpush.msrb.mxu2 %v1390_v29  ;;  %638 = vmatpush.msra.mxu1 %v1329_v3 }
 0x488   :  { %570 = vmatpush.msrb.mxu2 %v1410_v33  ;;  %639 = vmatpush.msra.mxu1 %v1337_v5 }
 0x48a   :  { %571 = vmatpush.msrb.mxu2 %v1423_v35  ;;  %640 = vmatpush.msra.mxu1 %v1346_v7 }
 0x4a2   :  { %v265_v21 = vpop.permute.xlu1 %264 }
 0x4a3   :  { %267 = vst.msk [vmem:[%s1753_s9] sm:$0xff] %vm63_vm0, %v265_v21  ;;  %1136 = vmatmul.msk.f32.vlgmr.msrb.gmra.mxu3 %vm63_vm0, %v265_v21 }
 0x4a4   :  { %592 = vmatpush.msrb.mxu3 %v1395_v30 }
 0x4a6   :  { %593 = vmatpush.msrb.mxu3 %v1402_v31 }
 0x4a8   :  { %594 = vmatpush.msrb.mxu3 %v1416_v34 }
 0x4aa   :  { %595 = vmatpush.msrb.mxu3 %v1436_v38 }
 0x500   :  { %v404_v24 = vpop.f32.mrf.mxu1 }
 0x501   :  { %v407_v25 = vadd.f32 %v404_v24, %v112_v23 }
 0x503   :  { %1178 = vtanh.f32 %v407_v25  ;;  %v408_v40 = vmul.f32 0.5, %v407_v25 }
 0x506   :  { %v333_v27 = vpop.f32.mrf.mxu2 }
 0x507   :  { %v334_v32 = vadd.f32 %v1469_v46, %v333_v27 }
 0x509   :  { %v1179_v26 = vpop.eup %1178 }
 0x50a   :  { %415 = vrot.lane.b32.xlu2 %v1179_v26, %s1256_s13 }
 0x526   :  { %v355_v36 = vpop.f32.mrf.mxu3 }
 0x527   :  { %v358_v37 = vadd.f32 %v355_v36, %v334_v32 }
 0x529   :  { %1180 = vtanh.f32 %v358_v37  ;;  %v359_v47 = vmul.f32 0.5, %v358_v37 }
 0x52a   :  { %1182 = vtanh.f32 %v408_v40 }
 0x52b   :  { %1184 = vtanh.f32 %v359_v47 }
 0x52f   :  { %v1181_v39 = vpop.eup %1180 }
 0x530   :  { %366 = vrot.lane.b32.xlu0 %v1181_v39, %s1256_s13  ;;  %v1183_v41 = vpop.eup %1182 }
 0x531   :  { %v410_v42 = vmul.f32 0.5, %v1183_v41  ;;  %v1185_v48 = vpop.eup %1184 }
 0x532   :  { %v361_v49 = vmul.f32 0.5, %v1185_v48 }
 0x533   :  { %v411_v43 = vadd.f32 0.5, %v410_v42 }
 0x534   :  { %v362_v50 = vadd.f32 0.5, %v361_v49 }
 0x535   :  { %v413_v53 = vmul.f32 %v411_v43, %v1477_v6 }
 0x536   :  { %v364_v57 = vmul.f32 %v362_v50, %v1481_v13 }
 0x564   :  { %v416_v44 = vpop.permute.xlu2 %415 }
 0x565   :  { %v418_v45 = vmul.f32 %v416_v44, %v411_v43 }
 0x567   :  { %420 = vrot.lane.b32.xlu1 %v418_v45, %s1257_s16 }
 0x5a2   :  { %v367_v51 = vpop.permute.xlu0 %366 }
 0x5a3   :  { %v369_v52 = vmul.f32 %v367_v51, %v362_v50 }
 0x5a5   :  { %371 = vrot.lane.b32.xlu2 %v369_v52, %s1257_s16 }
 0x5d9   :  { %v421_v54 = vpop.permute.xlu1 %420 }
 0x5da   :  { %v1517_v55 = vadd.f32 %v421_v54, %v413_v53 }
 0x5dc   :  { %1186 = vtanh.f32 %v1517_v55 }
 0x5e2   :  { %v1187_v56 = vpop.eup %1186 }
 0x5e3   :  { %426 = vrot.lane.b32.xlu0 %v1187_v56, %s1256_s13 }
 0x5ff   :  { %v372_v58 = vpop.permute.xlu2 %371 }
 0x600   :  { %v1522_v59 = vadd.f32 %v372_v58, %v364_v57 }
 0x602   :  { %1188 = vtanh.f32 %v1522_v59 }
 0x608   :  { %v1189_v60 = vpop.eup %1188 }
 0x609   :  { %377 = vrot.lane.b32.xlu1 %v1189_v60, %s1256_s13 }
 0x655   :  { %v427_v61 = vpop.permute.xlu0 %426 }
 0x656   :  { %v429_v62 = vmul.f32 %v427_v61, %v411_v43 }
 0x658   :  { %431 = vrot.lane.b32.xlu2 %v429_v62, %s1257_s16 }
 0x67b   :  { %v378_v0 = vpop.permute.xlu1 %377 }
 0x67c   :  { %v1531_v1 = vmul.f32 %v378_v0, %v362_v50  ;;  %v56_v50 = vld [vmem:[%s1746_s0 + $0x20] sm:$0xff] }
 0x67d   :  { %1125 = vmatmul.msk.f32.gmra.mxu0 %vm63_vm0, %v56_v50 }
 0x67e   :  { %455 = vrot.lane.b32.xlu0 %v1531_v1, %s1257_s16 }
 0x6b2   :  { %v432_v4 = vpop.permute.xlu2 %431 }
 0x6b3   :  { %1138 = vmatmul.msk.f32.vlgmr.msra.gmra.mxu2 %vm63_vm0, %v432_v4  ;;  %1140 = vmatmul.msk.f32.vlgmr.msrb.gmra.mxu1 %vm63_vm0, %v432_v4 }
 0x6b4   :  { %685 = vmatpush.msra.mxu2 %v1385_v28  ;;  %758 = vmatpush.msrb.mxu1 %v1323_v2 }
 0x6b6   :  { %686 = vmatpush.msra.mxu2 %v1390_v29  ;;  %759 = vmatpush.msrb.mxu1 %v1329_v3 }
 0x6b8   :  { %687 = vmatpush.msra.mxu2 %v1410_v33  ;;  %760 = vmatpush.msrb.mxu1 %v1337_v5 }
 0x6ba   :  { %688 = vmatpush.msra.mxu2 %v1423_v35  ;;  %761 = vmatpush.msrb.mxu1 %v1346_v7 }
 0x6f0   :  { %v456_v6 = vpop.permute.xlu0 %455 }
 0x6f1   :  { %1139 = vmatmul.msk.f32.vlgmr.msra.gmra.mxu3 %vm63_vm0, %v456_v6 }
 0x6f2   :  { %710 = vmatpush.msra.mxu3 %v1395_v30 }
 0x6f4   :  { %711 = vmatpush.msra.mxu3 %v1402_v31 }
 0x6f6   :  { %712 = vmatpush.msra.mxu3 %v1416_v34 }
 0x6f8   :  { %713 = vmatpush.msra.mxu3 %v1436_v38 }
 0x730   :  { %v525_v11 = vpop.f32.mrf.mxu1 }
 0x731   :  { %v528_v12 = vadd.f32 %v525_v11, %v115_v9 }
 0x733   :  { %1190 = vtanh.f32 %v528_v12  ;;  %v529_v19 = vmul.f32 0.5, %v528_v12 }
 0x736   :  { %v452_v14 = vpop.f32.mrf.mxu2 }
 0x737   :  { %v453_v15 = vadd.f32 %v1469_v46, %v452_v14 }
 0x739   :  { %v1191_v13 = vpop.eup %1190 }
 0x73a   :  { %536 = vrot.lane.b32.xlu1 %v1191_v13, %s1256_s13 }
 0x774   :  { %v476_v16 = vpop.f32.mrf.mxu3 }
 0x775   :  { %v479_v17 = vadd.f32 %v476_v16, %v453_v15 }
 0x777   :  { %1192 = vtanh.f32 %v479_v17  ;;  %v480_v25 = vmul.f32 0.5, %v479_v17 }
 0x778   :  { %1194 = vtanh.f32 %v529_v19 }
 0x779   :  { %1196 = vtanh.f32 %v480_v25 }
 0x77d   :  { %v1193_v18 = vpop.eup %1192 }
 0x77e   :  { %487 = vrot.lane.b32.xlu2 %v1193_v18, %s1256_s13  ;;  %v1195_v20 = vpop.eup %1194 }
 0x77f   :  { %v531_v21 = vmul.f32 0.5, %v1195_v20  ;;  %v1197_v26 = vpop.eup %1196 }
 0x780   :  { %v482_v27 = vmul.f32 0.5, %v1197_v26 }
 0x781   :  { %v532_v22 = vadd.f32 0.5, %v531_v21 }
 0x782   :  { %v483_v32 = vadd.f32 0.5, %v482_v27 }
 0x783   :  { %v534_v39 = vmul.f32 %v532_v22, %v1517_v55  ;;  %v117_v55 = vpop.f32.mrf.mxu0 }
 0x784   :  { %v485_v43 = vmul.f32 %v483_v32, %v1522_v59  ;;  %v118_v56 = vadd.f32 %v1369_v10, %v117_v55 }
 0x7ac   :  { %v537_v23 = vpop.permute.xlu1 %536 }
 0x7ad   :  { %v539_v24 = vmul.f32 %v537_v23, %v532_v22 }
 0x7af   :  { %541 = vrot.lane.b32.xlu0 %v539_v24, %s1257_s16 }
 0x7d8   :  { %v488_v36 = vpop.permute.xlu2 %487 }
 0x7d9   :  { %v490_v37 = vmul.f32 %v488_v36, %v483_v32  ;;  %v57_v36 = vld [vmem:[%s1746_s0 + $0x28] sm:$0xff] }
 0x7da   :  { %1126 = vmatmul.msk.f32.gmra.mxu0 %vm63_vm0, %v57_v36 }
 0x7db   :  { %492 = vrot.lane.b32.xlu1 %v490_v37, %s1257_s16 }
 0x821   :  { %v542_v40 = vpop.permute.xlu0 %541 }
 0x822   :  { %v1557_v41 = vadd.f32 %v542_v40, %v534_v39 }
 0x824   :  { %1198 = vtanh.f32 %v1557_v41 }
 0x82a   :  { %v1199_v42 = vpop.eup %1198 }
 0x82b   :  { %547 = vrot.lane.b32.xlu2 %v1199_v42, %s1256_s13 }
 0x84d   :  { %v493_v44 = vpop.permute.xlu1 %492 }
 0x84e   :  { %v1562_v45 = vadd.f32 %v493_v44, %v485_v43 }
 0x850   :  { %1200 = vtanh.f32 %v1562_v45 }
 0x856   :  { %v1201_v47 = vpop.eup %1200 }
 0x857   :  { %498 = vrot.lane.b32.xlu0 %v1201_v47, %s1256_s13 }
 0x885   :  { %v548_v48 = vpop.permute.xlu2 %547 }
 0x886   :  { %v550_v49 = vmul.f32 %v548_v48, %v532_v22 }
 0x888   :  { %552 = vrot.lane.b32.xlu1 %v550_v49, %s1257_s16 }
 0x8c9   :  { %v499_v51 = vpop.permute.xlu0 %498 }
 0x8ca   :  { %v1571_v52 = vmul.f32 %v499_v51, %v483_v32 }
 0x8cc   :  { %576 = vrot.lane.b32.xlu2 %v1571_v52, %s1257_s16 }
 0x8fa   :  { %v553_v53 = vpop.permute.xlu1 %552 }
 0x8fb   :  { %1141 = vmatmul.msk.f32.vlgmr.msrb.gmra.mxu2 %vm63_vm0, %v553_v53  ;;  %1143 = vmatmul.msk.f32.vlgmr.msra.gmra.mxu1 %vm63_vm0, %v553_v53 }
 0x8fc   :  { %806 = vmatpush.msrb.mxu2 %v1385_v28  ;;  %876 = vmatpush.msra.mxu1 %v1323_v2 }
 0x8fe   :  { %807 = vmatpush.msrb.mxu2 %v1390_v29  ;;  %877 = vmatpush.msra.mxu1 %v1329_v3 }
 0x900   :  { %808 = vmatpush.msrb.mxu2 %v1410_v33  ;;  %878 = vmatpush.msra.mxu1 %v1337_v5 }
 0x902   :  { %809 = vmatpush.msrb.mxu2 %v1423_v35  ;;  %879 = vmatpush.msra.mxu1 %v1346_v7 }
 0x926   :  { %v577_v54 = vpop.permute.xlu2 %576 }
 0x927   :  { %1142 = vmatmul.msk.f32.vlgmr.msrb.gmra.mxu3 %vm63_vm0, %v577_v54 }
 0x928   :  { %828 = vmatpush.msrb.mxu3 %v1395_v30 }
 0x92a   :  { %829 = vmatpush.msrb.mxu3 %v1402_v31 }
 0x92c   :  { %830 = vmatpush.msrb.mxu3 %v1416_v34 }
 0x92e   :  { %831 = vmatpush.msrb.mxu3 %v1436_v38 }
 0x978   :  { %v642_v57 = vpop.f32.mrf.mxu1 }
 0x979   :  { %v645_v58 = vadd.f32 %v642_v57, %v118_v56 }
 0x97b   :  { %1202 = vtanh.f32 %v645_v58  ;;  %v646_v4 = vmul.f32 0.5, %v645_v58 }
 0x97e   :  { %v573_v60 = vpop.f32.mrf.mxu2 }
 0x97f   :  { %v574_v61 = vadd.f32 %v1469_v46, %v573_v60 }
 0x981   :  { %v1203_v59 = vpop.eup %1202 }
 0x982   :  { %653 = vrot.lane.b32.xlu0 %v1203_v59, %s1256_s13 }
 0x9aa   :  { %v597_v62 = vpop.f32.mrf.mxu3 }
 0x9ab   :  { %v600_v63 = vadd.f32 %v597_v62, %v574_v61 }
 0x9ad   :  { %1204 = vtanh.f32 %v600_v63  ;;  %v601_v13 = vmul.f32 0.5, %v600_v63 }
 0x9ae   :  { %1206 = vtanh.f32 %v646_v4 }
 0x9af   :  { %1208 = vtanh.f32 %v601_v13 }
 0x9b3   :  { %v1205_v0 = vpop.eup %1204 }
 0x9b4   :  { %608 = vrot.lane.b32.xlu1 %v1205_v0, %s1256_s13  ;;  %v1207_v6 = vpop.eup %1206 }
 0x9b5   :  { %v648_v8 = vmul.f32 0.5, %v1207_v6  ;;  %v1209_v14 = vpop.eup %1208 }
 0x9b6   :  { %v603_v15 = vmul.f32 0.5, %v1209_v14  ;;  %v58_v14 = vld [vmem:[%s1746_s0 + $0x30] sm:$0xff] }
 0x9b7   :  { %v649_v9 = vadd.f32 0.5, %v648_v8  ;;  %1127 = vmatmul.msk.f32.gmra.mxu0 %vm63_vm0, %v58_v14 }
 0x9b8   :  { %v604_v16 = vadd.f32 0.5, %v603_v15 }
 0x9b9   :  { %v651_v19 = vmul.f32 %v649_v9, %v1557_v41 }
 0x9ba   :  { %v606_v23 = vmul.f32 %v604_v16, %v1562_v45 }
 0x9f4   :  { %v654_v11 = vpop.permute.xlu0 %653 }
 0x9f5   :  { %v656_v12 = vmul.f32 %v654_v11, %v649_v9 }
 0x9f7   :  { %658 = vrot.lane.b32.xlu2 %v656_v12, %s1257_s16 }
 0xa26   :  { %v609_v17 = vpop.permute.xlu1 %608 }
 0xa27   :  { %v611_v18 = vmul.f32 %v609_v17, %v604_v16 }
 0xa29   :  { %613 = vrot.lane.b32.xlu0 %v611_v18, %s1257_s16 }
 0xa51   :  { %v659_v20 = vpop.permute.xlu2 %658 }
 0xa52   :  { %v1597_v21 = vadd.f32 %v659_v20, %v651_v19 }
 0xa54   :  { %1210 = vtanh.f32 %v1597_v21 }
 0xa5a   :  { %v1211_v22 = vpop.eup %1210 }
 0xa5b   :  { %664 = vrot.lane.b32.xlu1 %v1211_v22, %s1256_s13 }
 0xa9b   :  { %v614_v24 = vpop.permute.xlu0 %613 }
 0xa9c   :  { %v1602_v25 = vadd.f32 %v614_v24, %v606_v23 }
 0xa9e   :  { %1212 = vtanh.f32 %v1602_v25 }
 0xaa4   :  { %v1213_v26 = vpop.eup %1212 }
 0xaa5   :  { %619 = vrot.lane.b32.xlu2 %v1213_v26, %s1256_s13 }
 0xacd   :  { %v665_v27 = vpop.permute.xlu1 %664 }
 0xace   :  { %v667_v32 = vmul.f32 %v665_v27, %v649_v9 }
 0xad0   :  { %669 = vrot.lane.b32.xlu0 %v667_v32, %s1257_s16 }
 0xaff   :  { %v620_v37 = vpop.permute.xlu2 %619 }
 0xb00   :  { %v1611_v39 = vmul.f32 %v620_v37, %v604_v16 }
 0xb02   :  { %694 = vrot.lane.b32.xlu1 %v1611_v39, %s1257_s16 }
 0xb42   :  { %v670_v40 = vpop.permute.xlu0 %669 }
 0xb43   :  { %1144 = vmatmul.msk.f32.vlgmr.msra.gmra.mxu2 %vm63_vm0, %v670_v40  ;;  %1146 = vmatmul.msk.f32.vlgmr.msrb.gmra.mxu1 %vm63_vm0, %v670_v40 }
 0xb44   :  { %924 = vmatpush.msra.mxu2 %v1385_v28  ;;  %996 = vmatpush.msrb.mxu1 %v1323_v2  ;;  %v120_v2 = vpop.f32.mrf.mxu0 }
 0xb46   :  { %925 = vmatpush.msra.mxu2 %v1390_v29  ;;  %997 = vmatpush.msrb.mxu1 %v1329_v3  ;;  %v121_v3 = vadd.f32 %v1369_v10, %v120_v2 }
 0xb48   :  { %926 = vmatpush.msra.mxu2 %v1410_v33  ;;  %998 = vmatpush.msrb.mxu1 %v1337_v5 }
 0xb4a   :  { %927 = vmatpush.msra.mxu2 %v1423_v35  ;;  %999 = vmatpush.msrb.mxu1 %v1346_v7 }
 0xb74   :  { %v695_v41 = vpop.permute.xlu1 %694 }
 0xb75   :  { %1145 = vmatmul.msk.f32.vlgmr.msra.gmra.mxu3 %vm63_vm0, %v695_v41 }
 0xb76   :  { %948 = vmatpush.msra.mxu3 %v1395_v30 }
 0xb78   :  { %949 = vmatpush.msra.mxu3 %v1402_v31 }
 0xb7a   :  { %950 = vmatpush.msra.mxu3 %v1416_v34 }
 0xb7c   :  { %951 = vmatpush.msra.mxu3 %v1436_v38 }
 0xbc0   :  { %v763_v42 = vpop.f32.mrf.mxu1 }
 0xbc1   :  { %v766_v5 = vadd.f32 %v763_v42, %v121_v3 }
 0xbc3   :  { %1214 = vtanh.f32 %v766_v5  ;;  %v767_v49 = vmul.f32 0.5, %v766_v5 }
 0xbc6   :  { %v690_v7 = vpop.f32.mrf.mxu2 }
 0xbc7   :  { %v691_v44 = vadd.f32 %v1469_v46, %v690_v7 }
 0xbc9   :  { %v1215_v43 = vpop.eup %1214 }
 0xbca   :  { %774 = vrot.lane.b32.xlu2 %v1215_v43, %s1256_s13 }
 0xbf8   :  { %v715_v45 = vpop.f32.mrf.mxu3 }
 0xbf9   :  { %v718_v47 = vadd.f32 %v715_v45, %v691_v44 }
 0xbfb   :  { %1216 = vtanh.f32 %v718_v47  ;;  %v719_v56 = vmul.f32 0.5, %v718_v47 }
 0xbfc   :  { %1218 = vtanh.f32 %v767_v49  ;;  %v59_v49 = vld [vmem:[%s1746_s0 + $0x38] sm:$0xff] }
 0xbfd   :  { %1220 = vtanh.f32 %v719_v56  ;;  %1128 = vmatmul.msk.f32.gmra.mxu0 %vm63_vm0, %v59_v49 }
 0xc01   :  { %v1217_v48 = vpop.eup %1216 }
 0xc02   :  { %726 = vrot.lane.b32.xlu0 %v1217_v48, %s1256_s13  ;;  %v1219_v50 = vpop.eup %1218 }
 0xc03   :  { %v769_v51 = vmul.f32 0.5, %v1219_v50  ;;  %v1221_v57 = vpop.eup %1220 }
 0xc04   :  { %v721_v58 = vmul.f32 0.5, %v1221_v57 }
 0xc05   :  { %v770_v53 = vadd.f32 0.5, %v769_v51 }
 0xc06   :  { %v722_v59 = vadd.f32 0.5, %v721_v58 }
 0xc07   :  { %v772_v62 = vmul.f32 %v770_v53, %v1597_v21 }
 0xc08   :  { %v724_v6 = vmul.f32 %v722_v59, %v1602_v25 }
 0xc24   :  { %v775_v54 = vpop.permute.xlu2 %774 }
 0xc25   :  { %v777_v55 = vmul.f32 %v775_v54, %v770_v53 }
 0xc27   :  { %779 = vrot.lane.b32.xlu1 %v777_v55, %s1257_s16 }
 0xc74   :  { %v727_v60 = vpop.permute.xlu0 %726 }
 0xc75   :  { %v729_v61 = vmul.f32 %v727_v60, %v722_v59 }
 0xc77   :  { %731 = vrot.lane.b32.xlu2 %v729_v61, %s1257_s16 }
 0xc99   :  { %v780_v63 = vpop.permute.xlu1 %779 }
 0xc9a   :  { %v782_v0 = vadd.f32 %v780_v63, %v772_v62 }
 0xc9c   :  { %1222 = vtanh.f32 %v782_v0 }
 0xca2   :  { %v1223_v4 = vpop.eup %1222 }
 0xca3   :  { %785 = vrot.lane.b32.xlu0 %v1223_v4, %s1256_s13 }
 0xcd1   :  { %v732_v8 = vpop.permute.xlu2 %731 }
 0xcd2   :  { %v734_v9 = vadd.f32 %v732_v8, %v724_v6 }
 0xcd4   :  { %1224 = vtanh.f32 %v734_v9 }
 0xcda   :  { %v1225_v11 = vpop.eup %1224 }
 0xcdb   :  { %737 = vrot.lane.b32.xlu1 %v1225_v11, %s1256_s13 }
 0xd15   :  { %v786_v12 = vpop.permute.xlu0 %785 }
 0xd16   :  { %v788_v13 = vmul.f32 %v786_v12, %v770_v53 }
 0xd18   :  { %790 = vrot.lane.b32.xlu2 %v788_v13, %s1257_s16 }
 0xd4d   :  { %v738_v15 = vpop.permute.xlu1 %737 }
 0xd4e   :  { %v740_v16 = vmul.f32 %v738_v15, %v722_v59 }
 0xd50   :  { %742 = vrot.lane.b32.xlu0 %v740_v16, %s1257_s16 }
 0xd72   :  { %v791_v17 = vpop.permute.xlu2 %790 }
 0xd73   :  { %1147 = vmatmul.msk.f32.vlgmr.msrb.gmra.mxu2 %vm63_vm0, %v791_v17  ;;  %1149 = vmatmul.msk.f32.vlgmr.msra.gmra.mxu1 %vm63_vm0, %v791_v17 }
 0xd74   :  { %1044 = vmatpush.msrb.mxu2 %v1385_v28  ;;  %v123_v28 = vpop.f32.mrf.mxu0 }
 0xd76   :  { %1045 = vmatpush.msrb.mxu2 %v1390_v29  ;;  %v124_v29 = vadd.f32 %v1369_v10, %v123_v28 }
 0xd78   :  { %1046 = vmatpush.msrb.mxu2 %v1410_v33 }
 0xd7a   :  { %1047 = vmatpush.msrb.mxu2 %v1423_v35 }
 0xd7c   :  { %v126_v55 = vpop.f32.mrf.mxu0 }
 0xd7d   :  { %v127_v56 = vadd.f32 %v1369_v10, %v126_v55 }
 0xdc2   :  { %v743_v18 = vpop.permute.xlu0 %742 }
 0xdc3   :  { %745 = vst.msk [vmem:[%s1753_s9 + $0x8] sm:$0xff] %vm63_vm0, %v743_v18  ;;  %1148 = vmatmul.msk.f32.vlgmr.msrb.gmra.mxu3 %vm63_vm0, %v743_v18 }
 0xdc4   :  { %1068 = vmatpush.msrb.mxu3 %v1395_v30 }
 0xdc6   :  { %1069 = vmatpush.msrb.mxu3 %v1402_v31 }
 0xdc8   :  { %1070 = vmatpush.msrb.mxu3 %v1416_v34 }
 0xdca   :  { %1071 = vmatpush.msrb.mxu3 %v1436_v38 }
 0xdf0   :  { %v881_v33 = vpop.f32.mrf.mxu1 }
 0xdf1   :  { %v884_v35 = vadd.f32 %v881_v33, %v124_v29 }
 0xdf3   :  { %1226 = vtanh.f32 %v884_v35  ;;  %v885_v34 = vmul.f32 0.5, %v884_v35 }
 0xdf6   :  { %v811_v20 = vpop.f32.mrf.mxu2 }
 0xdf7   :  { %v812_v21 = vadd.f32 %v1469_v46, %v811_v20 }
 0xdf9   :  { %v1227_v19 = vpop.eup %1226 }
 0xdfa   :  { %892 = vrot.lane.b32.xlu1 %v1227_v19, %s1256_s13 }
 0xe46   :  { %v833_v22 = vpop.f32.mrf.mxu3 }
 0xe47   :  { %v836_v30 = vadd.f32 %v833_v22, %v812_v21 }
 0xe49   :  { %1228 = vtanh.f32 %v836_v30  ;;  %v837_v27 = vmul.f32 0.5, %v836_v30 }
 0xe4a   :  { %1230 = vtanh.f32 %v885_v34 }
 0xe4b   :  { %1232 = vtanh.f32 %v837_v27 }
 0xe4f   :  { %v1229_v31 = vpop.eup %1228 }
 0xe50   :  { %844 = vrot.lane.b32.xlu2 %v1229_v31, %s1256_s13  ;;  %v1231_v38 = vpop.eup %1230 }
 0xe51   :  { %v887_v23 = vmul.f32 0.5, %v1231_v38  ;;  %v1233_v32 = vpop.eup %1232 }
 0xe52   :  { %v839_v36 = vmul.f32 0.5, %v1233_v32 }
 0xe53   :  { %v888_v24 = vadd.f32 0.5, %v887_v23 }
 0xe54   :  { %v840_v37 = vadd.f32 0.5, %v839_v36 }
 0xe55   :  { %v890_v2 = vmul.f32 %v888_v24, %v782_v0 }
 0xe56   :  { %v842_v43 = vmul.f32 %v840_v37, %v734_v9 }
 0xe6c   :  { %v893_v25 = vpop.permute.xlu1 %892 }
 0xe6d   :  { %v895_v26 = vmul.f32 %v893_v25, %v888_v24 }
 0xe6f   :  { %897 = vrot.lane.b32.xlu0 %v895_v26, %s1257_s16 }
 0xeaa   :  { %v845_v40 = vpop.permute.xlu2 %844 }
 0xeab   :  { %v847_v41 = vmul.f32 %v845_v40, %v840_v37 }
 0xead   :  { %849 = vrot.lane.b32.xlu1 %v847_v41, %s1257_s16 }
 0xee1   :  { %v898_v3 = vpop.permute.xlu0 %897 }
 0xee2   :  { %v900_v42 = vadd.f32 %v898_v3, %v890_v2 }
 0xee4   :  { %1234 = vtanh.f32 %v900_v42 }
 0xeea   :  { %v1235_v5 = vpop.eup %1234 }
 0xeeb   :  { %903 = vrot.lane.b32.xlu2 %v1235_v5, %s1256_s13 }
 0xf1f   :  { %v850_v7 = vpop.permute.xlu1 %849 }
 0xf20   :  { %v852_v44 = vadd.f32 %v850_v7, %v842_v43 }
 0xf22   :  { %1236 = vtanh.f32 %v852_v44 }
 0xf28   :  { %v1237_v45 = vpop.eup %1236 }
 0xf29   :  { %855 = vrot.lane.b32.xlu0 %v1237_v45, %s1256_s13 }
 0xf45   :  { %v904_v47 = vpop.permute.xlu2 %903 }
 0xf46   :  { %v906_v48 = vmul.f32 %v904_v47, %v888_v24 }
 0xf48   :  { %908 = vrot.lane.b32.xlu1 %v906_v48, %s1257_s16 }
 0xf9b   :  { %v856_v50 = vpop.permute.xlu0 %855 }
 0xf9c   :  { %v1674_v51 = vmul.f32 %v856_v50, %v840_v37 }
 0xf9e   :  { %932 = vrot.lane.b32.xlu2 %v1674_v51, %s1257_s16 }
 0xfba   :  { %v909_v53 = vpop.permute.xlu1 %908 }
 0xfbb   :  { %1150 = vmatmul.msk.f32.vlgmr.msra.gmra.mxu2 %vm63_vm0, %v909_v53  ;;  %1152 = vmatmul.msk.f32.vlgmr.msrb.gmra.mxu1 %vm63_vm0, %v909_v53 }
 0xff8   :  { %v933_v54 = vpop.permute.xlu2 %932 }
 0xff9   :  { %1151 = vmatmul.msk.f32.vlgmr.msra.gmra.mxu3 %vm63_vm0, %v933_v54 }
0x1038   :  { %v1001_v57 = vpop.f32.mrf.mxu1 }
0x1039   :  { %v1004_v58 = vadd.f32 %v1001_v57, %v127_v56 }
0x103b   :  { %1238 = vtanh.f32 %v1004_v58  ;;  %v1005_v4 = vmul.f32 0.5, %v1004_v58 }
0x103e   :  { %v929_v60 = vpop.f32.mrf.mxu2 }
0x103f   :  { %v930_v61 = vadd.f32 %v1469_v46, %v929_v60 }
0x1041   :  { %v1239_v59 = vpop.eup %1238 }
0x1042   :  { %1012 = vrot.lane.b32.xlu0 %v1239_v59, %s1256_s13 }
0x107c   :  { %v953_v62 = vpop.f32.mrf.mxu3 }
0x107d   :  { %v956_v63 = vadd.f32 %v953_v62, %v930_v61 }
0x107f   :  { %1240 = vtanh.f32 %v956_v63  ;;  %v957_v12 = vmul.f32 0.5, %v956_v63 }
0x1080   :  { %1242 = vtanh.f32 %v1005_v4 }
0x1081   :  { %1244 = vtanh.f32 %v957_v12 }
0x1085   :  { %v1241_v0 = vpop.eup %1240 }
0x1086   :  { %964 = vrot.lane.b32.xlu1 %v1241_v0, %s1256_s13  ;;  %v1243_v6 = vpop.eup %1242 }
0x1087   :  { %v1007_v8 = vmul.f32 0.5, %v1243_v6  ;;  %v1245_v13 = vpop.eup %1244 }
0x1088   :  { %v959_v14 = vmul.f32 0.5, %v1245_v13 }
0x1089   :  { %v1008_v10 = vadd.f32 0.5, %v1007_v8 }
0x108a   :  { %v960_v15 = vadd.f32 0.5, %v959_v14 }
0x108b   :  { %v1010_v18 = vmul.f32 %v1008_v10, %v900_v42 }
0x108c   :  { %v962_v35 = vmul.f32 %v960_v15, %v852_v44 }
0x10b4   :  { %v1013_v9 = vpop.permute.xlu0 %1012 }
0x10b5   :  { %v1015_v11 = vmul.f32 %v1013_v9, %v1008_v10 }
0x10b7   :  { %1017 = vrot.lane.b32.xlu2 %v1015_v11, %s1257_s16 }
0x10f8   :  { %v965_v16 = vpop.permute.xlu1 %964 }
0x10f9   :  { %v967_v17 = vmul.f32 %v965_v16, %v960_v15 }
0x10fb   :  { %969 = vrot.lane.b32.xlu0 %v967_v17, %s1257_s16 }
0x1111   :  { %v1018_v28 = vpop.permute.xlu2 %1017 }
0x1112   :  { %v1020_v29 = vadd.f32 %v1018_v28, %v1010_v18 }
0x1114   :  { %1246 = vtanh.f32 %v1020_v29 }
0x111a   :  { %v1247_v33 = vpop.eup %1246 }
0x111b   :  { %1023 = vrot.lane.b32.xlu1 %v1247_v33, %s1256_s13 }
0x116d   :  { %v970_v19 = vpop.permute.xlu0 %969 }
0x116e   :  { %v972_v20 = vadd.f32 %v970_v19, %v962_v35 }
0x1170   :  { %1248 = vtanh.f32 %v972_v20 }
0x1176   :  { %v1249_v21 = vpop.eup %1248 }
0x1177   :  { %975 = vrot.lane.b32.xlu2 %v1249_v21, %s1256_s13 }
0x118d   :  { %v1024_v22 = vpop.permute.xlu1 %1023 }
0x118e   :  { %v1026_v30 = vmul.f32 %v1024_v22, %v1008_v10 }
0x1190   :  { %1028 = vrot.lane.b32.xlu0 %v1026_v30, %s1257_s16 }
0x11d1   :  { %v976_v31 = vpop.permute.xlu2 %975 }
0x11d2   :  { %v978_v34 = vmul.f32 %v976_v31, %v960_v15 }
0x11d4   :  { %1052 = vrot.lane.b32.xlu1 %v978_v34, %s1257_s16 }
0x1202   :  { %v1029_v38 = vpop.permute.xlu0 %1028 }
0x1203   :  { %1101 = vst.msk [vmem:[%s1754_s10] sm:$0xff] %vm63_vm0, %v1029_v38  ;;  %1153 = vmatmul.msk.f32.vlgmr.msrb.gmra.mxu2 %vm63_vm0, %v1029_v38 }
0x1204   :  { %1102 = vst.msk [vmem:[%s1754_s10] sm:$0xff] %vm385_vm1, %v1020_v29 }
0x1246   :  { %v1053_v23 = vpop.permute.xlu1 %1052 }
0x1247   :  { %1154 = vmatmul.msk.f32.vlgmr.msrb.gmra.mxu3 %vm63_vm0, %v1053_v23 }
0x1286   :  { %v1049_v24 = vpop.f32.mrf.mxu2 }
0x1287   :  { %v1050_v25 = vadd.f32 %v1469_v46, %v1049_v24 }
0x12ca   :  { %v1073_v26 = vpop.f32.mrf.mxu3 }
0x12cb   :  { %v1076_v27 = vadd.f32 %v1073_v26, %v1050_v25 }
0x12cd   :  { %1250 = vtanh.f32 %v1076_v27  ;;  %v1077_v36 = vmul.f32 0.5, %v1076_v27 }
0x12cf   :  { %1252 = vtanh.f32 %v1077_v36 }
0x12d3   :  { %v1251_v32 = vpop.eup %1250 }
0x12d4   :  { %1084 = vrot.lane.b32.xlu2 %v1251_v32, %s1256_s13 }
0x12d5   :  { %v1253_v37 = vpop.eup %1252 }
0x12d6   :  { %v1079_v40 = vmul.f32 0.5, %v1253_v37 }
0x12d8   :  { %v1080_v41 = vadd.f32 0.5, %v1079_v40 }
0x12dc   :  { %382 = vrot.lane.b32.xlu2 %v1531_v1, %s1256_s13  ;;  %v1082_v1 = vmul.f32 %v1080_v41, %v972_v20 }
0x12e4   :  { %980 = vrot.lane.b32.xlu2 %v978_v34, %s1258_s12 }
0x132e   :  { %v1085_v2 = vpop.permute.xlu2 %1084 }
0x132f   :  { %v1087_v3 = vmul.f32 %v1085_v2, %v1080_v41 }
0x1331   :  { %1089 = vrot.lane.b32.xlu0 %v1087_v3, %s1257_s16 }
0x1336   :  { %v383_v46 = vpop.permute.xlu2 %382 }
0x1337   :  { %386 = vst.msk [vmem:[%s1753_s9] sm:$0xff] %vm385_vm1, %v383_v46 }
0x1339   :  { %860 = vrot.lane.b32.xlu0 %v1674_v51, %s1256_s13 }
0x133e   :  { %v981_v44 = vpop.permute.xlu2 %980 }
0x13a3   :  { %v1090_v42 = vpop.permute.xlu0 %1089 }
0x13a4   :  { %v1092_v5 = vadd.f32 %v1090_v42, %v1082_v1 }
0x13a6   :  { %1254 = vtanh.f32 %v1092_v5 }
0x13ab   :  { %v861_v43 = vpop.permute.xlu0 %860 }
0x13ac   :  { %v1255_v7 = vpop.eup %1254  ;;  %863 = vst.msk [vmem:[%s1753_s9 + $0x8] sm:$0xff] %vm385_vm1, %v861_v43 }
0x13ad   :  { %983 = vst.msk [vmem:[%s1753_s9 + $0x8] sm:$0xff] %vm506_vm2, %v981_v44  ;;  %1095 = vrot.lane.b32.xlu1 %v1255_v7, %s1256_s13 }
0x13b5   :  { %503 = vrot.lane.b32.xlu1 %v1571_v52, %s1258_s12 }
0x13bd   :  { %1109 = vrot.lane.b32.xlu1 %v1092_v5, %s1256_s13 }
0x141f   :  { %v1096_v45 = vpop.permute.xlu1 %1095 }
0x1420   :  { %v1098_v47 = vmul.f32 %v1096_v45, %v1080_v41 }
0x1422   :  { %1099 = vst.msk [vmem:[%s1753_s9 + $0x8] sm:$0xff] %vm623_vm3, %v1098_v47  ;;  %1104 = vrot.lane.b32.xlu0 %v1098_v47, %s1258_s12 }
0x1427   :  { %v504_v48 = vpop.permute.xlu1 %503 }
0x1428   :  { %507 = vst.msk [vmem:[%s1753_s9] sm:$0xff] %vm506_vm2, %v504_v48 }
0x1429   :  { %624 = vst.msk [vmem:[%s1753_s9] sm:$0xff] %vm623_vm3, %v1611_v39 }
0x142f   :  { %v1110_v49 = vpop.permute.xlu1 %1109 }
0x1494   :  { %v1105_v52 = vpop.permute.xlu0 %1104 }
0x1495   :  { %1107 = vst.msk [vmem:[%s1754_s10] sm:$0xff] %vm506_vm2, %v1105_v52 }
0x1496   :  { %1112 = vst.msk [vmem:[%s1754_s10] sm:$0xff] %vm623_vm3, %v1110_v49 }

</bundles_post_ra>
